<compile_context>
chip_gen: v7x
topology: tpu7x:2x2x1
jax: 0.10.0
libtpu: 0.0.40
codegen_flags: <defaults>
</compile_context>

<pallas_src>
import functools

import jax
import jax.numpy as jnp
from jax import lax
from jax.experimental import pallas as pl
from jax.experimental.pallas import tpu as pltpu

_LANES = 128
_BIAS_ROWS = 8                                   # 2 used, padded to a sublane multiple
_ROWS_PER_LAYER = 3 * _LANES + _BIAS_ROWS        # [W_ih | W_hh | W_head | biases]


def _make_fused_kernel(S, B, out_dims):
    """Fused multi-layer Mean_var_rnn kernel (all shapes static)."""
    L = len(out_dims)

    def kernel(x_ref, p_ref, out_ref, hstack_ref):
        # x_ref:      (S*B, 128)   zero-padded input, time-major rows (t*B + b)
        # p_ref:      (L*392, 128) packed per-layer parameters
        # out_ref:    (L*S*B, 128) fused [mean | softplus(var) | 0...] per layer
        # hstack_ref: (S*B, 128)   scratch for the stacked hidden states
        cur = x_ref[...]                                            # (S*B, 128) f32

        for l in range(L):
            O = out_dims[l]
            base = l * _ROWS_PER_LAYER
            wih    = p_ref[pl.ds(base,              _LANES), :]    # (128, 128)
            whh    = p_ref[pl.ds(base + _LANES,     _LANES), :]    # (128, 128)
            whead  = p_ref[pl.ds(base + 2 * _LANES, _LANES), :]    # (128, 128)
            b_rnn  = p_ref[pl.ds(base + 3 * _LANES,     1), :]     # (1, 128)
            b_head = p_ref[pl.ds(base + 3 * _LANES + 1, 1), :]     # (1, 128)

            # ---- hoisted input projection: one (S*B,128)x(128,128) MXU pass ----
            xw = jnp.dot(cur, wih, preferred_element_type=jnp.float32) + b_rnn

            # ---- serial recurrence (S static, unrolled); h carried in registers,
            # each step's h stored straight into the VMEM scratch ----
            h = jnp.zeros((B, _LANES), jnp.float32)                 # h_0 = 0
            for t in range(S):
                h = jnp.tanh(xw[t * B:(t + 1) * B, :]
                             + jnp.dot(h, whh, preferred_element_type=jnp.float32))
                hstack_ref[pl.ds(t * B, B), :] = h
            hstack = hstack_ref[...]                                # (S*B, 128)

            # ---- fused mean/var heads: one (S*B,128)x(128,128) matmul;
            # softplus (beta=1, threshold=20, PyTorch default) on the var half ----
            head = jnp.dot(hstack, whead, preferred_element_type=jnp.float32) + b_head
            sp = jnp.where(head > 20.0, head,
                           jnp.log1p(jnp.exp(jnp.minimum(head, 20.0))))
            col = lax.broadcasted_iota(jnp.int32, head.shape, 1)
            fused = jnp.where((col >= O) & (col < 2 * O), sp, head)

            # Lane-dense, unmasked store into the merged output slab.
            out_ref[pl.ds(l * S * B, S * B), :] = fused

            # Next layer consumes concat(mean, var) == fused (cols >= 2*O are 0).
            cur = fused

    return kernel


def _pack_layer(p, hidden_dim, out_dim):
    """Pack one layer's parameters into a (392, 128) lane-aligned slab."""
    H = hidden_dim
    in_dim = p["w_ih"].shape[1]
    pack = jnp.zeros((_ROWS_PER_LAYER, _LANES), jnp.float32)
    pack = pack.at[:in_dim, :H].set(p["w_ih"].T)                       # (D, H)
    pack = pack.at[_LANES:_LANES + H, :H].set(p["w_hh"].T)             # (H, H)
    w_head = jnp.concatenate([p["w_mean"].T, p["w_var"].T], axis=1)    # (H, 2*O)
    pack = pack.at[2 * _LANES:2 * _LANES + H, :2 * out_dim].set(w_head)
    pack = pack.at[3 * _LANES, :H].set(p["b_ih"] + p["b_hh"])          # folded RNN bias
    pack = pack.at[3 * _LANES + 1, :2 * out_dim].set(
        jnp.concatenate([p["b_mean"], p["b_var"]]))
    return pack


@functools.partial(jax.jit, static_argnames=("hidden_dim", "out_dims"))
def mean_var_multilayer(x, layer_params, hidden_dim, out_dims):
    """Fused forward of Mean_var_multilayer.

    x: (S, B, D0) float32, time-major.
    layer_params: list of dicts with PyTorch-layout weights
      w_ih (H, D), w_hh (H, H), b_ih (H,), b_hh (H,),
      w_mean (O, H), b_mean (O,), w_var (O, H), b_var (O,).
    Returns ([mean_l], [var_l]) matching the PyTorch module.
    """
    S, B, D0 = x.shape
    L = len(layer_params)
    assert L == len(out_dims)
    assert D0 <= _LANES and hidden_dim <= _LANES
    assert all(2 * o <= _LANES for o in out_dims)
    # TODO(synk): dims > 128 would need real lane tiling instead of zero-padding.

    # 2-D, lane-padded input (cheap at the XLA boundary; avoids in-kernel relayouts).
    x_pad = jnp.zeros((S * B, _LANES), jnp.float32)
    x_pad = x_pad.at[:, :D0].set(x.reshape(S * B, D0).astype(jnp.float32))

    # One contiguous, lane-aligned parameter slab for all layers -> one DMA.
    params = jnp.concatenate(
        [_pack_layer(p, hidden_dim, o) for p, o in zip(layer_params, out_dims)],
        axis=0)                                                        # (L*392, 128)

    out = pl.pallas_call(
        _make_fused_kernel(S, B, tuple(out_dims)),
        out_shape=jax.ShapeDtypeStruct((L * S * B, _LANES), jnp.float32),
        scratch_shapes=[pltpu.VMEM((S * B, _LANES), jnp.float32)],
    )(x_pad, params)

    out4 = out.reshape(L, S, B, _LANES)
    means = [out4[l, :, :, :o] for l, o in enumerate(out_dims)]
    vars_ = [out4[l, :, :, o:2 * o] for l, o in enumerate(out_dims)]
    return means, vars_


def _ref_forward(x, layer_params, hidden_dim):
    """Pure-JAX reference (mirrors the PyTorch module) for a correctness check."""
    means, vars_ = [], []
    cur = x
    for p in layer_params:
        S, B, _ = cur.shape
        h = jnp.zeros((B, hidden_dim), jnp.float32)
        hs = []
        for t in range(S):
            h = jnp.tanh(cur[t] @ p["w_ih"].T + p["b_ih"]
                         + h @ p["w_hh"].T + p["b_hh"])
            hs.append(h)
        hst = jnp.stack(hs, axis=0)                        # (S, B, H)
        m = hst @ p["w_mean"].T + p["b_mean"]
        v = jax.nn.softplus(hst @ p["w_var"].T + p["b_var"])
        means.append(m)
        vars_.append(v)
        cur = jnp.concatenate([m, v], axis=2)
    return means, vars_


def init_layer_params(key, in_dim, out_dim, hidden_dim):
    """Deterministic synthetic parameters (shapes match nn.RNN + two nn.Linear heads)."""
    ks = jax.random.split(key, 8)
    s = 1.0 / jnp.sqrt(hidden_dim)
    return {
        "w_ih":   jax.random.uniform(ks[0], (hidden_dim, in_dim), jnp.float32, -s, s),
        "w_hh":   jax.random.uniform(ks[1], (hidden_dim, hidden_dim), jnp.float32, -s, s),
        "b_ih":   jax.random.uniform(ks[2], (hidden_dim,), jnp.float32, -s, s),
        "b_hh":   jax.random.uniform(ks[3], (hidden_dim,), jnp.float32, -s, s),
        "w_mean": jax.random.uniform(ks[4], (out_dim, hidden_dim), jnp.float32, -s, s),
        "b_mean": jax.random.uniform(ks[5], (out_dim,), jnp.float32, -s, s),
        "w_var":  jax.random.uniform(ks[6], (out_dim, hidden_dim), jnp.float32, -s, s),
        "b_var":  jax.random.uniform(ks[7], (out_dim,), jnp.float32, -s, s),
    }


if __name__ == "__main__":
    # Mirrors Mean_var_multilayer(p_layer_num=2, p_input_dims=[6,5],
    # p_output_dims=[5,3], p_hidden_dim=32, rnn_type='rnn', bidirectional=False).
    layer_num = 2
    p_input_dims = [6, 5]
    p_output_dims = [5, 3]
    hidden_dim = 32
    seq_len, batch = 8, 2

    # Effective per-layer input dims: layer 0 raw; layer l>0 gets concat(mean, var).
    eff_in_dims = [d if i == 0 else o2 * 2
                   for i, (d, o2) in enumerate(zip(p_input_dims,
                                                   [0] + p_output_dims[:-1]))]

    key = jax.random.PRNGKey(0)
    keys = jax.random.split(key, layer_num + 1)
    layer_params = [
        init_layer_params(keys[l], eff_in_dims[l], p_output_dims[l], hidden_dim)
        for l in range(layer_num)
    ]

    x = jax.random.normal(keys[-1], (seq_len, batch, p_input_dims[0]), dtype=jnp.float32)

    out_means, out_vars = mean_var_multilayer(x, layer_params, hidden_dim,
                                              tuple(p_output_dims))
    for m, v in zip(out_means, out_vars):
        jax.block_until_ready(m)
        jax.block_until_ready(v)

    # Sanity: shapes, positivity, and agreement with the pure-JAX reference.
    assert out_means[0].shape == (seq_len, batch, p_output_dims[0])
    assert out_means[1].shape == (seq_len, batch, p_output_dims[1])
    assert bool(jnp.all(out_vars[0] > 0)) and bool(jnp.all(out_vars[1] > 0))

    ref_means, ref_vars = _ref_forward(x, layer_params, hidden_dim)
    for got, ref in list(zip(out_means, ref_means)) + list(zip(out_vars, ref_vars)):
        assert bool(jnp.allclose(got, ref, rtol=2e-3, atol=2e-3)), (
            float(jnp.max(jnp.abs(got - ref))))

    print("KERNEL_OK")
</pallas_src>

<mosaic_0001>
module attributes {stable_mosaic.version = 11 : i64} {
  func.func @kernel(%arg0: memref<16x128xf32, #tpu.memory_space<vmem>>, %arg1: memref<784x128xf32, #tpu.memory_space<vmem>>, %arg2: memref<32x128xf32, #tpu.memory_space<vmem>>, %arg3: memref<16x128xf32, #tpu.memory_space<vmem>>) attributes {dimension_semantics = [], scalar_prefetch = 0 : i64, scratch_operands = 1 : i64, tpu.core_type = #tpu.core_type<tc>} {
    %c0 = arith.constant 0 : index
    %c0_0 = arith.constant 0 : index
    %0 = vector.load %arg0[%c0, %c0_0] : memref<16x128xf32, #tpu.memory_space<vmem>>, vector<16x128xf32>
    %c0_1 = arith.constant 0 : index
    %c0_2 = arith.constant 0 : index
    %1 = vector.load %arg1[%c0_1, %c0_2] : memref<784x128xf32, #tpu.memory_space<vmem>>, vector<128x128xf32>
    %c128 = arith.constant 128 : index
    %c0_3 = arith.constant 0 : index
    %2 = vector.load %arg1[%c128, %c0_3] : memref<784x128xf32, #tpu.memory_space<vmem>>, vector<128x128xf32>
    %c256 = arith.constant 256 : index
    %c0_4 = arith.constant 0 : index
    %3 = vector.load %arg1[%c256, %c0_4] : memref<784x128xf32, #tpu.memory_space<vmem>>, vector<128x128xf32>
    %c384 = arith.constant 384 : index
    %c0_5 = arith.constant 0 : index
    %4 = vector.load %arg1[%c384, %c0_5] : memref<784x128xf32, #tpu.memory_space<vmem>>, vector<1x128xf32>
    %c385 = arith.constant 385 : index
    %c0_6 = arith.constant 0 : index
    %5 = vector.load %arg1[%c385, %c0_6] : memref<784x128xf32, #tpu.memory_space<vmem>>, vector<1x128xf32>
    %cst = arith.constant dense<0.000000e+00> : vector<16x128xf32>
    %6 = tpu.matmul %0, %1, %cst {dimension_numbers = #tpu.dot_dimension_numbers<[1], [0], [0], [1], [0, 0, 1, 1], [], []>} : vector<16x128xf32>, vector<128x128xf32>, vector<16x128xf32> -> vector<16x128xf32>
    %7 = vector.broadcast %4 : vector<1x128xf32> to vector<16x128xf32>
    %8 = arith.addf %6, %7 : vector<16x128xf32>
    %cst_7 = arith.constant 0.000000e+00 : f32
    %9 = vector.broadcast %cst_7 : f32 to vector<2x128xf32>
    %10 = vector.extract_strided_slice %8 {offsets = [0, 0], sizes = [2, 128], strides = [1, 1]} : vector<16x128xf32> to vector<2x128xf32>
    %cst_8 = arith.constant dense<0.000000e+00> : vector<2x128xf32>
    %11 = tpu.matmul %9, %2, %cst_8 {dimension_numbers = #tpu.dot_dimension_numbers<[1], [0], [0], [1], [0, 0, 1, 1], [], []>} : vector<2x128xf32>, vector<128x128xf32>, vector<2x128xf32> -> vector<2x128xf32>
    %12 = arith.addf %10, %11 : vector<2x128xf32>
    %13 = math.tanh %12 : vector<2x128xf32>
    %c0_9 = arith.constant 0 : index
    %c0_10 = arith.constant 0 : index
    %14 = vector.load %arg3[%c0_9, %c0_10] : memref<16x128xf32, #tpu.memory_space<vmem>>, vector<2x128xf32>
    tpu.vector_store %arg3[%c0_9, %c0_10], %13 {strides = array<i32>} : memref<16x128xf32, #tpu.memory_space<vmem>>, vector<2x128xf32>,
    %15 = vector.extract_strided_slice %8 {offsets = [2, 0], sizes = [2, 128], strides = [1, 1]} : vector<16x128xf32> to vector<2x128xf32>
    %cst_11 = arith.constant dense<0.000000e+00> : vector<2x128xf32>
    %16 = tpu.matmul %13, %2, %cst_11 {dimension_numbers = #tpu.dot_dimension_numbers<[1], [0], [0], [1], [0, 0, 1, 1], [], []>} : vector<2x128xf32>, vector<128x128xf32>, vector<2x128xf32> -> vector<2x128xf32>
    %17 = arith.addf %15, %16 : vector<2x128xf32>
    %18 = math.tanh %17 : vector<2x128xf32>
    %c2 = arith.constant 2 : index
    %c0_12 = arith.constant 0 : index
    %19 = vector.load %arg3[%c2, %c0_12] : memref<16x128xf32, #tpu.memory_space<vmem>>, vector<2x128xf32>
    tpu.vector_store %arg3[%c2, %c0_12], %18 {strides = array<i32>} : memref<16x128xf32, #tpu.memory_space<vmem>>, vector<2x128xf32>,
    %20 = vector.extract_strided_slice %8 {offsets = [4, 0], sizes = [2, 128], strides = [1, 1]} : vector<16x128xf32> to vector<2x128xf32>
    %cst_13 = arith.constant dense<0.000000e+00> : vector<2x128xf32>
    %21 = tpu.matmul %18, %2, %cst_13 {dimension_numbers = #tpu.dot_dimension_numbers<[1], [0], [0], [1], [0, 0, 1, 1], [], []>} : vector<2x128xf32>, vector<128x128xf32>, vector<2x128xf32> -> vector<2x128xf32>
    %22 = arith.addf %20, %21 : vector<2x128xf32>
    %23 = math.tanh %22 : vector<2x128xf32>
    %c4 = arith.constant 4 : index
    %c0_14 = arith.constant 0 : index
    %24 = vector.load %arg3[%c4, %c0_14] : memref<16x128xf32, #tpu.memory_space<vmem>>, vector<2x128xf32>
    tpu.vector_store %arg3[%c4, %c0_14], %23 {strides = array<i32>} : memref<16x128xf32, #tpu.memory_space<vmem>>, vector<2x128xf32>,
    %25 = vector.extract_strided_slice %8 {offsets = [6, 0], sizes = [2, 128], strides = [1, 1]} : vector<16x128xf32> to vector<2x128xf32>
    %cst_15 = arith.constant dense<0.000000e+00> : vector<2x128xf32>
    %26 = tpu.matmul %23, %2, %cst_15 {dimension_numbers = #tpu.dot_dimension_numbers<[1], [0], [0], [1], [0, 0, 1, 1], [], []>} : vector<2x128xf32>, vector<128x128xf32>, vector<2x128xf32> -> vector<2x128xf32>
    %27 = arith.addf %25, %26 : vector<2x128xf32>
    %28 = math.tanh %27 : vector<2x128xf32>
    %c6 = arith.constant 6 : index
    %c0_16 = arith.constant 0 : index
    %29 = vector.load %arg3[%c6, %c0_16] : memref<16x128xf32, #tpu.memory_space<vmem>>, vector<2x128xf32>
    tpu.vector_store %arg3[%c6, %c0_16], %28 {strides = array<i32>} : memref<16x128xf32, #tpu.memory_space<vmem>>, vector<2x128xf32>,
    %30 = vector.extract_strided_slice %8 {offsets = [8, 0], sizes = [2, 128], strides = [1, 1]} : vector<16x128xf32> to vector<2x128xf32>
    %cst_17 = arith.constant dense<0.000000e+00> : vector<2x128xf32>
    %31 = tpu.matmul %28, %2, %cst_17 {dimension_numbers = #tpu.dot_dimension_numbers<[1], [0], [0], [1], [0, 0, 1, 1], [], []>} : vector<2x128xf32>, vector<128x128xf32>, vector<2x128xf32> -> vector<2x128xf32>
    %32 = arith.addf %30, %31 : vector<2x128xf32>
    %33 = math.tanh %32 : vector<2x128xf32>
    %c8 = arith.constant 8 : index
    %c0_18 = arith.constant 0 : index
    %34 = vector.load %arg3[%c8, %c0_18] : memref<16x128xf32, #tpu.memory_space<vmem>>, vector<2x128xf32>
    tpu.vector_store %arg3[%c8, %c0_18], %33 {strides = array<i32>} : memref<16x128xf32, #tpu.memory_space<vmem>>, vector<2x128xf32>,
    %35 = vector.extract_strided_slice %8 {offsets = [10, 0], sizes = [2, 128], strides = [1, 1]} : vector<16x128xf32> to vector<2x128xf32>
    %cst_19 = arith.constant dense<0.000000e+00> : vector<2x128xf32>
    %36 = tpu.matmul %33, %2, %cst_19 {dimension_numbers = #tpu.dot_dimension_numbers<[1], [0], [0], [1], [0, 0, 1, 1], [], []>} : vector<2x128xf32>, vector<128x128xf32>, vector<2x128xf32> -> vector<2x128xf32>
    %37 = arith.addf %35, %36 : vector<2x128xf32>
    %38 = math.tanh %37 : vector<2x128xf32>
    %c10 = arith.constant 10 : index
    %c0_20 = arith.constant 0 : index
    %39 = vector.load %arg3[%c10, %c0_20] : memref<16x128xf32, #tpu.memory_space<vmem>>, vector<2x128xf32>
    tpu.vector_store %arg3[%c10, %c0_20], %38 {strides = array<i32>} : memref<16x128xf32, #tpu.memory_space<vmem>>, vector<2x128xf32>,
    %40 = vector.extract_strided_slice %8 {offsets = [12, 0], sizes = [2, 128], strides = [1, 1]} : vector<16x128xf32> to vector<2x128xf32>
    %cst_21 = arith.constant dense<0.000000e+00> : vector<2x128xf32>
    %41 = tpu.matmul %38, %2, %cst_21 {dimension_numbers = #tpu.dot_dimension_numbers<[1], [0], [0], [1], [0, 0, 1, 1], [], []>} : vector<2x128xf32>, vector<128x128xf32>, vector<2x128xf32> -> vector<2x128xf32>
    %42 = arith.addf %40, %41 : vector<2x128xf32>
    %43 = math.tanh %42 : vector<2x128xf32>
    %c12 = arith.constant 12 : index
    %c0_22 = arith.constant 0 : index
    %44 = vector.load %arg3[%c12, %c0_22] : memref<16x128xf32, #tpu.memory_space<vmem>>, vector<2x128xf32>
    tpu.vector_store %arg3[%c12, %c0_22], %43 {strides = array<i32>} : memref<16x128xf32, #tpu.memory_space<vmem>>, vector<2x128xf32>,
    %45 = vector.extract_strided_slice %8 {offsets = [14, 0], sizes = [2, 128], strides = [1, 1]} : vector<16x128xf32> to vector<2x128xf32>
    %cst_23 = arith.constant dense<0.000000e+00> : vector<2x128xf32>
    %46 = tpu.matmul %43, %2, %cst_23 {dimension_numbers = #tpu.dot_dimension_numbers<[1], [0], [0], [1], [0, 0, 1, 1], [], []>} : vector<2x128xf32>, vector<128x128xf32>, vector<2x128xf32> -> vector<2x128xf32>
    %47 = arith.addf %45, %46 : vector<2x128xf32>
    %48 = math.tanh %47 : vector<2x128xf32>
    %c14 = arith.constant 14 : index
    %c0_24 = arith.constant 0 : index
    %49 = vector.load %arg3[%c14, %c0_24] : memref<16x128xf32, #tpu.memory_space<vmem>>, vector<2x128xf32>
    tpu.vector_store %arg3[%c14, %c0_24], %48 {strides = array<i32>} : memref<16x128xf32, #tpu.memory_space<vmem>>, vector<2x128xf32>,
    %c0_25 = arith.constant 0 : index
    %c0_26 = arith.constant 0 : index
    %50 = vector.load %arg3[%c0_25, %c0_26] : memref<16x128xf32, #tpu.memory_space<vmem>>, vector<16x128xf32>
    %cst_27 = arith.constant dense<0.000000e+00> : vector<16x128xf32>
    %51 = tpu.matmul %50, %3, %cst_27 {dimension_numbers = #tpu.dot_dimension_numbers<[1], [0], [0], [1], [0, 0, 1, 1], [], []>} : vector<16x128xf32>, vector<128x128xf32>, vector<16x128xf32> -> vector<16x128xf32>
    %52 = vector.broadcast %5 : vector<1x128xf32> to vector<16x128xf32>
    %53 = arith.addf %51, %52 : vector<16x128xf32>
    %cst_28 = arith.constant 2.000000e+01 : f32
    %54 = vector.broadcast %cst_28 : f32 to vector<16x128xf32>
    %55 = arith.cmpf ogt, %53, %54 : vector<16x128xf32>
    %cst_29 = arith.constant 2.000000e+01 : f32
    %56 = vector.broadcast %cst_29 : f32 to vector<16x128xf32>
    %57 = arith.minimumf %53, %56 : vector<16x128xf32>
    %58 = math.exp %57 : vector<16x128xf32>
    %59 = math.log1p %58 : vector<16x128xf32>
    %60 = arith.select %55, %53, %59 : vector<16x128xi1>, vector<16x128xf32>
    %61 = tpu.iota {dimensions = array<i32: 1>} : vector<16x128xi32>
    %c5_i32 = arith.constant 5 : i32
    %62 = vector.broadcast %c5_i32 : i32 to vector<16x128xi32>
    %63 = arith.cmpi sge, %61, %62 : vector<16x128xi32>
    %c10_i32 = arith.constant 10 : i32
    %64 = vector.broadcast %c10_i32 : i32 to vector<16x128xi32>
    %65 = arith.cmpi slt, %61, %64 : vector<16x128xi32>
    %66 = arith.andi %63, %65 : vector<16x128xi1>
    %67 = arith.select %66, %60, %53 : vector<16x128xi1>, vector<16x128xf32>
    %c0_30 = arith.constant 0 : index
    %c0_31 = arith.constant 0 : index
    %68 = vector.load %arg2[%c0_30, %c0_31] : memref<32x128xf32, #tpu.memory_space<vmem>>, vector<16x128xf32>
    tpu.vector_store %arg2[%c0_30, %c0_31], %67 {strides = array<i32>} : memref<32x128xf32, #tpu.memory_space<vmem>>, vector<16x128xf32>,
    %c392 = arith.constant 392 : index
    %c0_32 = arith.constant 0 : index
    %69 = vector.load %arg1[%c392, %c0_32] : memref<784x128xf32, #tpu.memory_space<vmem>>, vector<128x128xf32>
    %c520 = arith.constant 520 : index
    %c0_33 = arith.constant 0 : index
    %70 = vector.load %arg1[%c520, %c0_33] : memref<784x128xf32, #tpu.memory_space<vmem>>, vector<128x128xf32>
    %c648 = arith.constant 648 : index
    %c0_34 = arith.constant 0 : index
    %71 = vector.load %arg1[%c648, %c0_34] : memref<784x128xf32, #tpu.memory_space<vmem>>, vector<128x128xf32>
    %c776 = arith.constant 776 : index
    %c0_35 = arith.constant 0 : index
    %72 = vector.load %arg1[%c776, %c0_35] : memref<784x128xf32, #tpu.memory_space<vmem>>, vector<1x128xf32>
    %c777 = arith.constant 777 : index
    %c0_36 = arith.constant 0 : index
    %73 = vector.load %arg1[%c777, %c0_36] : memref<784x128xf32, #tpu.memory_space<vmem>>, vector<1x128xf32>
    %cst_37 = arith.constant dense<0.000000e+00> : vector<16x128xf32>
    %74 = tpu.matmul %67, %69, %cst_37 {dimension_numbers = #tpu.dot_dimension_numbers<[1], [0], [0], [1], [0, 0, 1, 1], [], []>} : vector<16x128xf32>, vector<128x128xf32>, vector<16x128xf32> -> vector<16x128xf32>
    %75 = vector.broadcast %72 : vector<1x128xf32> to vector<16x128xf32>
    %76 = arith.addf %74, %75 : vector<16x128xf32>
    %cst_38 = arith.constant 0.000000e+00 : f32
    %77 = vector.broadcast %cst_38 : f32 to vector<2x128xf32>
    %78 = vector.extract_strided_slice %76 {offsets = [0, 0], sizes = [2, 128], strides = [1, 1]} : vector<16x128xf32> to vector<2x128xf32>
    %cst_39 = arith.constant dense<0.000000e+00> : vector<2x128xf32>
    %79 = tpu.matmul %77, %70, %cst_39 {dimension_numbers = #tpu.dot_dimension_numbers<[1], [0], [0], [1], [0, 0, 1, 1], [], []>} : vector<2x128xf32>, vector<128x128xf32>, vector<2x128xf32> -> vector<2x128xf32>
    %80 = arith.addf %78, %79 : vector<2x128xf32>
    %81 = math.tanh %80 : vector<2x128xf32>
    %c0_40 = arith.constant 0 : index
    %c0_41 = arith.constant 0 : index
    %82 = vector.load %arg3[%c0_40, %c0_41] : memref<16x128xf32, #tpu.memory_space<vmem>>, vector<2x128xf32>
    tpu.vector_store %arg3[%c0_40, %c0_41], %81 {strides = array<i32>} : memref<16x128xf32, #tpu.memory_space<vmem>>, vector<2x128xf32>,
    %83 = vector.extract_strided_slice %76 {offsets = [2, 0], sizes = [2, 128], strides = [1, 1]} : vector<16x128xf32> to vector<2x128xf32>
    %cst_42 = arith.constant dense<0.000000e+00> : vector<2x128xf32>
    %84 = tpu.matmul %81, %70, %cst_42 {dimension_numbers = #tpu.dot_dimension_numbers<[1], [0], [0], [1], [0, 0, 1, 1], [], []>} : vector<2x128xf32>, vector<128x128xf32>, vector<2x128xf32> -> vector<2x128xf32>
    %85 = arith.addf %83, %84 : vector<2x128xf32>
    %86 = math.tanh %85 : vector<2x128xf32>
    %c2_43 = arith.constant 2 : index
    %c0_44 = arith.constant 0 : index
    %87 = vector.load %arg3[%c2_43, %c0_44] : memref<16x128xf32, #tpu.memory_space<vmem>>, vector<2x128xf32>
    tpu.vector_store %arg3[%c2_43, %c0_44], %86 {strides = array<i32>} : memref<16x128xf32, #tpu.memory_space<vmem>>, vector<2x128xf32>,
    %88 = vector.extract_strided_slice %76 {offsets = [4, 0], sizes = [2, 128], strides = [1, 1]} : vector<16x128xf32> to vector<2x128xf32>
    %cst_45 = arith.constant dense<0.000000e+00> : vector<2x128xf32>
    %89 = tpu.matmul %86, %70, %cst_45 {dimension_numbers = #tpu.dot_dimension_numbers<[1], [0], [0], [1], [0, 0, 1, 1], [], []>} : vector<2x128xf32>, vector<128x128xf32>, vector<2x128xf32> -> vector<2x128xf32>
    %90 = arith.addf %88, %89 : vector<2x128xf32>
    %91 = math.tanh %90 : vector<2x128xf32>
    %c4_46 = arith.constant 4 : index
    %c0_47 = arith.constant 0 : index
    %92 = vector.load %arg3[%c4_46, %c0_47] : memref<16x128xf32, #tpu.memory_space<vmem>>, vector<2x128xf32>
    tpu.vector_store %arg3[%c4_46, %c0_47], %91 {strides = array<i32>} : memref<16x128xf32, #tpu.memory_space<vmem>>, vector<2x128xf32>,
    %93 = vector.extract_strided_slice %76 {offsets = [6, 0], sizes = [2, 128], strides = [1, 1]} : vector<16x128xf32> to vector<2x128xf32>
    %cst_48 = arith.constant dense<0.000000e+00> : vector<2x128xf32>
    %94 = tpu.matmul %91, %70, %cst_48 {dimension_numbers = #tpu.dot_dimension_numbers<[1], [0], [0], [1], [0, 0, 1, 1], [], []>} : vector<2x128xf32>, vector<128x128xf32>, vector<2x128xf32> -> vector<2x128xf32>
    %95 = arith.addf %93, %94 : vector<2x128xf32>
    %96 = math.tanh %95 : vector<2x128xf32>
    %c6_49 = arith.constant 6 : index
    %c0_50 = arith.constant 0 : index
    %97 = vector.load %arg3[%c6_49, %c0_50] : memref<16x128xf32, #tpu.memory_space<vmem>>, vector<2x128xf32>
    tpu.vector_store %arg3[%c6_49, %c0_50], %96 {strides = array<i32>} : memref<16x128xf32, #tpu.memory_space<vmem>>, vector<2x128xf32>,
    %98 = vector.extract_strided_slice %76 {offsets = [8, 0], sizes = [2, 128], strides = [1, 1]} : vector<16x128xf32> to vector<2x128xf32>
    %cst_51 = arith.constant dense<0.000000e+00> : vector<2x128xf32>
    %99 = tpu.matmul %96, %70, %cst_51 {dimension_numbers = #tpu.dot_dimension_numbers<[1], [0], [0], [1], [0, 0, 1, 1], [], []>} : vector<2x128xf32>, vector<128x128xf32>, vector<2x128xf32> -> vector<2x128xf32>
    %100 = arith.addf %98, %99 : vector<2x128xf32>
    %101 = math.tanh %100 : vector<2x128xf32>
    %c8_52 = arith.constant 8 : index
    %c0_53 = arith.constant 0 : index
    %102 = vector.load %arg3[%c8_52, %c0_53] : memref<16x128xf32, #tpu.memory_space<vmem>>, vector<2x128xf32>
    tpu.vector_store %arg3[%c8_52, %c0_53], %101 {strides = array<i32>} : memref<16x128xf32, #tpu.memory_space<vmem>>, vector<2x128xf32>,
    %103 = vector.extract_strided_slice %76 {offsets = [10, 0], sizes = [2, 128], strides = [1, 1]} : vector<16x128xf32> to vector<2x128xf32>
    %cst_54 = arith.constant dense<0.000000e+00> : vector<2x128xf32>
    %104 = tpu.matmul %101, %70, %cst_54 {dimension_numbers = #tpu.dot_dimension_numbers<[1], [0], [0], [1], [0, 0, 1, 1], [], []>} : vector<2x128xf32>, vector<128x128xf32>, vector<2x128xf32> -> vector<2x128xf32>
    %105 = arith.addf %103, %104 : vector<2x128xf32>
    %106 = math.tanh %105 : vector<2x128xf32>
    %c10_55 = arith.constant 10 : index
    %c0_56 = arith.constant 0 : index
    %107 = vector.load %arg3[%c10_55, %c0_56] : memref<16x128xf32, #tpu.memory_space<vmem>>, vector<2x128xf32>
    tpu.vector_store %arg3[%c10_55, %c0_56], %106 {strides = array<i32>} : memref<16x128xf32, #tpu.memory_space<vmem>>, vector<2x128xf32>,
    %108 = vector.extract_strided_slice %76 {offsets = [12, 0], sizes = [2, 128], strides = [1, 1]} : vector<16x128xf32> to vector<2x128xf32>
    %cst_57 = arith.constant dense<0.000000e+00> : vector<2x128xf32>
    %109 = tpu.matmul %106, %70, %cst_57 {dimension_numbers = #tpu.dot_dimension_numbers<[1], [0], [0], [1], [0, 0, 1, 1], [], []>} : vector<2x128xf32>, vector<128x128xf32>, vector<2x128xf32> -> vector<2x128xf32>
    %110 = arith.addf %108, %109 : vector<2x128xf32>
    %111 = math.tanh %110 : vector<2x128xf32>
    %c12_58 = arith.constant 12 : index
    %c0_59 = arith.constant 0 : index
    %112 = vector.load %arg3[%c12_58, %c0_59] : memref<16x128xf32, #tpu.memory_space<vmem>>, vector<2x128xf32>
    tpu.vector_store %arg3[%c12_58, %c0_59], %111 {strides = array<i32>} : memref<16x128xf32, #tpu.memory_space<vmem>>, vector<2x128xf32>,
    %113 = vector.extract_strided_slice %76 {offsets = [14, 0], sizes = [2, 128], strides = [1, 1]} : vector<16x128xf32> to vector<2x128xf32>
    %cst_60 = arith.constant dense<0.000000e+00> : vector<2x128xf32>
    %114 = tpu.matmul %111, %70, %cst_60 {dimension_numbers = #tpu.dot_dimension_numbers<[1], [0], [0], [1], [0, 0, 1, 1], [], []>} : vector<2x128xf32>, vector<128x128xf32>, vector<2x128xf32> -> vector<2x128xf32>
    %115 = arith.addf %113, %114 : vector<2x128xf32>
    %116 = math.tanh %115 : vector<2x128xf32>
    %c14_61 = arith.constant 14 : index
    %c0_62 = arith.constant 0 : index
    %117 = vector.load %arg3[%c14_61, %c0_62] : memref<16x128xf32, #tpu.memory_space<vmem>>, vector<2x128xf32>
    tpu.vector_store %arg3[%c14_61, %c0_62], %116 {strides = array<i32>} : memref<16x128xf32, #tpu.memory_space<vmem>>, vector<2x128xf32>,
    %c0_63 = arith.constant 0 : index
    %c0_64 = arith.constant 0 : index
    %118 = vector.load %arg3[%c0_63, %c0_64] : memref<16x128xf32, #tpu.memory_space<vmem>>, vector<16x128xf32>
    %cst_65 = arith.constant dense<0.000000e+00> : vector<16x128xf32>
    %119 = tpu.matmul %118, %71, %cst_65 {dimension_numbers = #tpu.dot_dimension_numbers<[1], [0], [0], [1], [0, 0, 1, 1], [], []>} : vector<16x128xf32>, vector<128x128xf32>, vector<16x128xf32> -> vector<16x128xf32>
    %120 = vector.broadcast %73 : vector<1x128xf32> to vector<16x128xf32>
    %121 = arith.addf %119, %120 : vector<16x128xf32>
    %cst_66 = arith.constant 2.000000e+01 : f32
    %122 = vector.broadcast %cst_66 : f32 to vector<16x128xf32>
    %123 = arith.cmpf ogt, %121, %122 : vector<16x128xf32>
    %cst_67 = arith.constant 2.000000e+01 : f32
    %124 = vector.broadcast %cst_67 : f32 to vector<16x128xf32>
    %125 = arith.minimumf %121, %124 : vector<16x128xf32>
    %126 = math.exp %125 : vector<16x128xf32>
    %127 = math.log1p %126 : vector<16x128xf32>
    %128 = arith.select %123, %121, %127 : vector<16x128xi1>, vector<16x128xf32>
    %129 = tpu.iota {dimensions = array<i32: 1>} : vector<16x128xi32>
    %c3_i32 = arith.constant 3 : i32
    %130 = vector.broadcast %c3_i32 : i32 to vector<16x128xi32>
    %131 = arith.cmpi sge, %129, %130 : vector<16x128xi32>
    %c6_i32 = arith.constant 6 : i32
    %132 = vector.broadcast %c6_i32 : i32 to vector<16x128xi32>
    %133 = arith.cmpi slt, %129, %132 : vector<16x128xi32>
    %134 = arith.andi %131, %133 : vector<16x128xi1>
    %135 = arith.select %134, %128, %121 : vector<16x128xi1>, vector<16x128xf32>
    %c16 = arith.constant 16 : index
    %c0_68 = arith.constant 0 : index
    %136 = vector.load %arg2[%c16, %c0_68] : memref<32x128xf32, #tpu.memory_space<vmem>>, vector<16x128xf32>
    tpu.vector_store %arg2[%c16, %c0_68], %135 {strides = array<i32>} : memref<32x128xf32, #tpu.memory_space<vmem>>, vector<16x128xf32>,
    return
  }
}

</mosaic_0001>

<bundles_post_ra>
// kernel: mean_var_multilayer.1
= control target key start
LH: loop header
LB: loop body
LE: loop exit
PB: predicated region body
PF: predicated region fallthrough
CT: control target
= control target key end

     0   :  { %v3354_v2 = vmov 0.0|0.0   ;;  %vm3355_vm0 = vmmov 0   ;;  %v3356_v4 = vmov 0.0   ;;  %s4042_s1 = inlined_call_operand.vmem [shape: f32[784,128], index: 1, kind: input, shape index: {}]   ;;  %s4043_s0 = inlined_call_operand.vmem [shape: f32[16,128], index: 0, kind: input, shape index: {}]   ;;  %s4044_s2 = inlined_call_operand.vmem [shape: f32[32,128], index: 2, kind: output, shape index: {}]  }
   0x1   :  { %v13_v0 = vld [vmem:[%s4042_s1] sm:$0xff]  ;;  %v14_v1 = vld [vmem:[%s4042_s1 + $0x8] sm:$0xff]  ;;  %2823 = vmatprep.subr.bf16.mxu1 %v3354_v2  ;;  %2158 = vmatprep.mubr.msk.f32.mxu1 %vm3355_vm0, %v3356_v4  ;;  %v15_v7 = vld [vmem:[%s4042_s1 + $0x10] sm:$0xff] }
   0x2   :  { %v29_v3 = vld [vmem:[%s4042_s1 + $0x80] sm:$0xff]  ;;  %v2791_v5 = vpack.c.bf16 %v14_v1, %v13_v0  ;;  %v30_v6 = vld [vmem:[%s4042_s1 + $0x88] sm:$0xff]  ;;  %v16_v8 = vld [vmem:[%s4042_s1 + $0x18] sm:$0xff] }
   0x3   :  { %v3393_v9 = vpack.c.bf16 %v30_v6, %v29_v3  ;;  %v2795_v10 = vpack.c.bf16 %v16_v8, %v15_v7  ;;  %v31_v11 = vld [vmem:[%s4042_s1 + $0x90] sm:$0xff]  ;;  %v32_v12 = vld [vmem:[%s4042_s1 + $0x98] sm:$0xff]  ;;  %v17_v13 = vld [vmem:[%s4042_s1 + $0x20] sm:$0xff] }
   0x4   :  { %2792 = vmatprep.subr.bf16.mxu0 %v2791_v5  ;;  %v18_v14 = vld [vmem:[%s4042_s1 + $0x28] sm:$0xff]  ;;  %v3408_v15 = vpack.c.bf16 %v32_v12, %v31_v11  ;;  %v33_v17 = vld [vmem:[%s4042_s1 + $0xa0] sm:$0xff]  ;;  %v19_v19 = vld [vmem:[%s4042_s1 + $0x30] sm:$0xff] }
   0x5   :  { %2794 = vmatpush3.bf16.msra.mxu0 %v2791_v5  ;;  %2825 = vmatpush3.bf16.msra.mxu1 %v3393_v9  ;;  %v2799_v16 = vpack.c.bf16 %v18_v14, %v17_v13  ;;  %v34_v18 = vld [vmem:[%s4042_s1 + $0xa8] sm:$0xff]  ;;  %v20_v20 = vld [vmem:[%s4042_s1 + $0x38] sm:$0xff]  ;;  %v35_v23 = vld [vmem:[%s4042_s1 + $0xb0] sm:$0xff] }
   0x6   :  { %2796 = vmatprep.subr.bf16.mxu0 %v2795_v10  ;;  %2826 = vmatprep.subr.bf16.mxu1 %v3354_v2  ;;  %v3424_v21 = vpack.c.bf16 %v34_v18, %v33_v17  ;;  %v2803_v22 = vpack.c.bf16 %v20_v20, %v19_v19  ;;  %v36_v24 = vld [vmem:[%s4042_s1 + $0xb8] sm:$0xff]  ;;  %v21_v25 = vld [vmem:[%s4042_s1 + $0x40] sm:$0xff]  ;;  %v22_v26 = vld [vmem:[%s4042_s1 + $0x48] sm:$0xff] }
   0x7   :  { %v11_v27 = vld [vmem:[%s4043_s0] sm:$0xff]  ;;  %v3443_v28 = vpack.c.bf16 %v36_v24, %v35_v23  ;;  %v2807_v29 = vpack.c.bf16 %v22_v26, %v21_v25  ;;  %v38_v31 = vld [vmem:[%s4042_s1 + $0xc8] sm:$0xff]  ;;  %v23_v32 = vld [vmem:[%s4042_s1 + $0x50] sm:$0xff] }
   0x8   :  { %2123 = vmatprep.mubr.f32.mxu0 %v11_v27  ;;  %v37_v30 = vld [vmem:[%s4042_s1 + $0xc0] sm:$0xff]  ;;  %v24_v33 = vld [vmem:[%s4042_s1 + $0x58] sm:$0xff]  ;;  %v39_v36 = vld [vmem:[%s4042_s1 + $0xd0] sm:$0xff] }
   0x9   :  { %2798 = vmatpush3.bf16.msra.mxu0 %v2795_v10  ;;  %2828 = vmatpush3.bf16.msra.mxu1 %v3408_v15  ;;  %v3459_v34 = vpack.c.bf16 %v38_v31, %v37_v30  ;;  %v2811_v35 = vpack.c.bf16 %v24_v33, %v23_v32  ;;  %v40_v37 = vld [vmem:[%s4042_s1 + $0xd8] sm:$0xff]  ;;  %v25_v38 = vld [vmem:[%s4042_s1 + $0x60] sm:$0xff]  ;;  %v26_v39 = vld [vmem:[%s4042_s1 + $0x68] sm:$0xff] }
   0xa   :  { %2800 = vmatprep.subr.bf16.mxu0 %v2799_v16  ;;  %2829 = vmatprep.subr.bf16.mxu1 %v3354_v2  ;;  %v3475_v40 = vpack.c.bf16 %v40_v37, %v39_v36  ;;  %v2815_v41 = vpack.c.bf16 %v26_v39, %v25_v38  ;;  %v41_v42 = vld [vmem:[%s4042_s1 + $0xe0] sm:$0xff]  ;;  %v42_v43 = vld [vmem:[%s4042_s1 + $0xe8] sm:$0xff]  ;;  %v27_v44 = vld [vmem:[%s4042_s1 + $0x70] sm:$0xff] }
   0xb   :  { %v28_v45 = vld [vmem:[%s4042_s1 + $0x78] sm:$0xff]  ;;  %v3491_v46 = vpack.c.bf16 %v42_v43, %v41_v42  ;;  %v43_v48 = vld [vmem:[%s4042_s1 + $0xf0] sm:$0xff]  ;;  %v12_v51 = vld [vmem:[%s4043_s0 + $0x8] sm:$0xff] }
   0xc   :  { %v2819_v47 = vpack.c.bf16 %v28_v45, %v27_v44  ;;  %v44_v49 = vld [vmem:[%s4042_s1 + $0xf8] sm:$0xff]  ;;  %v1743_v52 = vld [vmem:[%s4042_s1 + $0x180] ss:$0 sm:$0xff]  ;;  %v47_v30 = vld [vmem:[%s4042_s1 + $0x110] sm:$0xff] }
   0xd   :  { %2802 = vmatpush3.bf16.msra.mxu0 %v2799_v16  ;;  %2831 = vmatpush3.bf16.msra.mxu1 %v3424_v21  ;;  %v3501_v50 = vpack.c.bf16 %v44_v49, %v43_v48  ;;  %v48_v32 = vld [vmem:[%s4042_s1 + $0x118] sm:$0xff]  ;;  %v51_v43 = vld [vmem:[%s4042_s1 + $0x130] sm:$0xff] }
   0xe   :  { %2804 = vmatprep.subr.bf16.mxu0 %v2803_v22  ;;  %2832 = vmatprep.subr.bf16.mxu1 %v3354_v2  ;;  %v3019_v33 = vpack.c.bf16 %v48_v32, %v47_v30  ;;  %v52_v44 = vld [vmem:[%s4042_s1 + $0x138] sm:$0xff]  ;;  %v55_v49 = vld [vmem:[%s4042_s1 + $0x150] sm:$0xff]  ;;  %v888_v30 = vld [vmem:[%s4042_s1 + $0x1e0] sm:$0xff] }
   0xf   :  { %v3027_v45 = vpack.c.bf16 %v52_v44, %v51_v43  ;;  %v902_v32 = vld [vmem:[%s4042_s1 + $0x250] sm:$0xff]  ;;  %v905_v43 = vld [vmem:[%s4042_s1 + $0x268] sm:$0xff] }
  0x10   :  { %v906_v44 = vld [vmem:[%s4042_s1 + $0x270] sm:$0xff] }
  0x11   :  { %2806 = vmatpush3.bf16.msra.mxu0 %v2803_v22  ;;  %2834 = vmatpush3.bf16.msra.mxu1 %v3443_v28 }
  0x12   :  { %2808 = vmatprep.subr.bf16.mxu0 %v2807_v29  ;;  %2835 = vmatprep.subr.bf16.mxu1 %v3354_v2 }
  0x15   :  { %2810 = vmatpush3.bf16.msra.mxu0 %v2807_v29  ;;  %2837 = vmatpush3.bf16.msra.mxu1 %v3459_v34  ;;  %v46_v29 = vld [vmem:[%s4042_s1 + $0x108] sm:$0xff] }
  0x16   :  { %2812 = vmatprep.subr.bf16.mxu0 %v2811_v35  ;;  %2838 = vmatprep.subr.bf16.mxu1 %v3354_v2 }
  0x19   :  { %2814 = vmatpush3.bf16.msra.mxu0 %v2811_v35  ;;  %2840 = vmatpush3.bf16.msra.mxu1 %v3475_v40 }
  0x1a   :  { %2816 = vmatprep.subr.bf16.mxu0 %v2815_v41  ;;  %2841 = vmatprep.subr.bf16.mxu1 %v3354_v2 }
  0x1d   :  { %2818 = vmatpush3.bf16.msra.mxu0 %v2815_v41  ;;  %2843 = vmatpush3.bf16.msra.mxu1 %v3491_v46  ;;  %v50_v41 = vld [vmem:[%s4042_s1 + $0x128] sm:$0xff] }
  0x1e   :  { %2820 = vmatprep.subr.bf16.mxu0 %v2819_v47  ;;  %2844 = vmatprep.subr.bf16.mxu1 %v3354_v2 }
  0x21   :  { %2822 = vmatpush3.bf16.msra.mxu0 %v2819_v47  ;;  %2846 = vmatpush3.bf16.msra.mxu1 %v3501_v50  ;;  %v54_v47 = vld [vmem:[%s4042_s1 + $0x148] sm:$0xff] }
  0x22   :  { %2847 = vmatprep.subr.bf16.mxu0 %v3354_v2  ;;  %2871 = vmatprep.subr.bf16.mxu1 %v3354_v2 }
  0x24   :  { %2124 = vmatmul.mubr.f32.vlgmr.msra.gmra.mrb[0].mxu0 %v12_v51  ;;  %2159 = vmatmul.mubr.f32.vlgmr.msra.gmra.mrb[0].mxu1 %v3356_v4 }
  0x25   :  { %2849 = vmatpush3.bf16.msra.mxu0 %v3393_v9  ;;  %2193 = vmatprep.mubr.msk.f32.mxu0 %vm3355_vm0, %v3356_v4 }
  0x26   :  { %2850 = vmatprep.subr.bf16.mxu0 %v3354_v2  ;;  %2873 = vmatpush3.bf16.msra.mxu1 %v3393_v9 }
  0x27   :  { %2874 = vmatprep.subr.bf16.mxu1 %v3354_v2  ;;  %2228 = vmatprep.mubr.msk.f32.mxu1 %vm3355_vm0, %v3356_v4 }
  0x29   :  { %2852 = vmatpush3.bf16.msra.mxu0 %v3408_v15 }
  0x2a   :  { %2853 = vmatprep.subr.bf16.mxu0 %v3354_v2  ;;  %2876 = vmatpush3.bf16.msra.mxu1 %v3408_v15 }
  0x2b   :  { %2877 = vmatprep.subr.bf16.mxu1 %v3354_v2 }
  0x2d   :  { %2855 = vmatpush3.bf16.msra.mxu0 %v3424_v21 }
  0x2e   :  { %2856 = vmatprep.subr.bf16.mxu0 %v3354_v2  ;;  %2879 = vmatpush3.bf16.msra.mxu1 %v3424_v21 }
  0x2f   :  { %2880 = vmatprep.subr.bf16.mxu1 %v3354_v2 }
  0x31   :  { %2858 = vmatpush3.bf16.msra.mxu0 %v3443_v28 }
  0x32   :  { %2859 = vmatprep.subr.bf16.mxu0 %v3354_v2  ;;  %2882 = vmatpush3.bf16.msra.mxu1 %v3443_v28 }
  0x33   :  { %2883 = vmatprep.subr.bf16.mxu1 %v3354_v2 }
  0x35   :  { %2861 = vmatpush3.bf16.msra.mxu0 %v3459_v34 }
  0x36   :  { %2862 = vmatprep.subr.bf16.mxu0 %v3354_v2  ;;  %2885 = vmatpush3.bf16.msra.mxu1 %v3459_v34 }
  0x37   :  { %2886 = vmatprep.subr.bf16.mxu1 %v3354_v2 }
  0x39   :  { %2864 = vmatpush3.bf16.msra.mxu0 %v3475_v40 }
  0x3a   :  { %2865 = vmatprep.subr.bf16.mxu0 %v3354_v2  ;;  %2888 = vmatpush3.bf16.msra.mxu1 %v3475_v40 }
  0x3b   :  { %2889 = vmatprep.subr.bf16.mxu1 %v3354_v2 }
  0x3d   :  { %2867 = vmatpush3.bf16.msra.mxu0 %v3491_v46 }
  0x3e   :  { %2868 = vmatprep.subr.bf16.mxu0 %v3354_v2  ;;  %2891 = vmatpush3.bf16.msra.mxu1 %v3491_v46 }
  0x3f   :  { %2892 = vmatprep.subr.bf16.mxu1 %v3354_v2 }
  0x41   :  { %2870 = vmatpush3.bf16.msra.mxu0 %v3501_v50 }
  0x42   :  { %2894 = vmatpush3.bf16.msra.mxu1 %v3501_v50  ;;  %2895 = vmatprep.subr.bf16.mxu0 %v3354_v2 }
  0x43   :  { %2919 = vmatprep.subr.bf16.mxu1 %v3354_v2 }
  0xf7   :  { %v2125_v53 = vpop.f32.mrb[0].mxu0  ;;  %v208_v54 = vpop.f32.mrb[0].mxu1 }
  0xf8   :  { %v3550_v55 = vadd.f32 %v2125_v53, %v1743_v52  ;;  %v133_v56 = vpop.f32.mrb[1].mxu0  ;;  %v2160_v57 = vpop.f32.mrb[1].mxu1  ;;  %v58_v53 = vld [vmem:[%s4042_s1 + $0x168] sm:$0xff] }
  0xf9   :  { %v3552_v58 = vadd.f32 %v1743_v52, %v133_v56  ;;  %v57_v52 = vld [vmem:[%s4042_s1 + $0x160] sm:$0xff]  ;;  %v59_v56 = vld [vmem:[%s4042_s1 + $0x170] sm:$0xff]  ;;  %v60_v57 = vld [vmem:[%s4042_s1 + $0x178] sm:$0xff] }
  0xfb   :  { %v212_v59 = vadd.f32 %v208_v54, %v3552_v58  ;;  %v3039_v54 = vpack.c.bf16 %v58_v53, %v57_v52 }
  0xfd   :  { %3306 = vtanh.f32 %v212_v59 }
 0x107   :  { %v3307_v60 = vpop.eup %3306 }
 0x108   :  { %214 = vst [vmem:[#allocation2] sm:$0x3] %v3307_v60  ;;  %2194 = vmatmul.mubr.f32.vlgmr.msra.gmra.mrb[2].mxu0 %v3307_v60 }
 0x109   :  { %2897 = vmatpush3.bf16.msra.mxu0 %v3393_v9  ;;  %2263 = vmatprep.mubr.msk.f32.mxu0 %vm3355_vm0, %v3356_v4 }
 0x10a   :  { %2898 = vmatprep.subr.bf16.mxu0 %v3354_v2 }
 0x10d   :  { %2900 = vmatpush3.bf16.msra.mxu0 %v3408_v15 }
 0x10e   :  { %2901 = vmatprep.subr.bf16.mxu0 %v3354_v2 }
 0x111   :  { %2903 = vmatpush3.bf16.msra.mxu0 %v3424_v21 }
 0x112   :  { %2904 = vmatprep.subr.bf16.mxu0 %v3354_v2 }
 0x115   :  { %2906 = vmatpush3.bf16.msra.mxu0 %v3443_v28 }
 0x116   :  { %2907 = vmatprep.subr.bf16.mxu0 %v3354_v2 }
 0x119   :  { %2909 = vmatpush3.bf16.msra.mxu0 %v3459_v34 }
 0x11a   :  { %2910 = vmatprep.subr.bf16.mxu0 %v3354_v2 }
 0x11d   :  { %2912 = vmatpush3.bf16.msra.mxu0 %v3475_v40 }
 0x11e   :  { %2913 = vmatprep.subr.bf16.mxu0 %v3354_v2 }
 0x121   :  { %2915 = vmatpush3.bf16.msra.mxu0 %v3491_v46 }
 0x122   :  { %2916 = vmatprep.subr.bf16.mxu0 %v3354_v2 }
 0x125   :  { %2918 = vmatpush3.bf16.msra.mxu0 %v3501_v50 }
 0x126   :  { %2943 = vmatprep.subr.bf16.mxu0 %v3354_v2 }
 0x1db   :  { %v281_v61 = vpop.f32.mrb[2].mxu0 }
 0x1dc   :  { %v286_v62 = vrot.slane %v281_v61, 6  ;;  %v2195_v63 = vpop.f32.mrb[3].mxu0 }
 0x1de   :  { %v288_v0 = vadd.f32 %v286_v62, %v3552_v58 }
 0x1e0   :  { %3308 = vtanh.f32 %v288_v0 }
 0x1ea   :  { %v3309_v1 = vpop.eup %3308 }
 0x1eb   :  { %290 = vst [vmem:[#allocation2] sm:$0xc] %v3309_v1  ;;  %v292_v3 = vrot.slane %v3309_v1, 2  ;;  %v877_v1 = vld [vmem:[%s4042_s1 + $0x188] sm:$0xff] }
 0x1ed   :  { %2229 = vmatmul.mubr.f32.vlgmr.msra.gmra.mrb[2].mxu1 %v292_v3  ;;  %v878_v3 = vld [vmem:[%s4042_s1 + $0x190] sm:$0xff] }
 0x1ee   :  { %2921 = vmatpush3.bf16.msra.mxu1 %v3393_v9  ;;  %2298 = vmatprep.mubr.msk.f32.mxu1 %vm3355_vm0, %v3356_v4 }
 0x1ef   :  { %2922 = vmatprep.subr.bf16.mxu1 %v3354_v2 }
 0x1f2   :  { %2924 = vmatpush3.bf16.msra.mxu1 %v3408_v15 }
 0x1f3   :  { %2925 = vmatprep.subr.bf16.mxu1 %v3354_v2 }
 0x1f6   :  { %2927 = vmatpush3.bf16.msra.mxu1 %v3424_v21 }
 0x1f7   :  { %2928 = vmatprep.subr.bf16.mxu1 %v3354_v2 }
 0x1fa   :  { %2930 = vmatpush3.bf16.msra.mxu1 %v3443_v28 }
 0x1fb   :  { %2931 = vmatprep.subr.bf16.mxu1 %v3354_v2 }
 0x1fe   :  { %2933 = vmatpush3.bf16.msra.mxu1 %v3459_v34 }
 0x1ff   :  { %2934 = vmatprep.subr.bf16.mxu1 %v3354_v2 }
 0x202   :  { %2936 = vmatpush3.bf16.msra.mxu1 %v3475_v40 }
 0x203   :  { %2937 = vmatprep.subr.bf16.mxu1 %v3354_v2 }
 0x206   :  { %2939 = vmatpush3.bf16.msra.mxu1 %v3491_v46 }
 0x207   :  { %2940 = vmatprep.subr.bf16.mxu1 %v3354_v2 }
 0x20a   :  { %2942 = vmatpush3.bf16.msra.mxu1 %v3501_v50 }
 0x20b   :  { %2967 = vmatprep.subr.bf16.mxu1 %v3354_v2 }
 0x2c0   :  { %v360_v5 = vpop.f32.mrb[2].mxu1 }
 0x2c1   :  { %v365_v6 = vrot.slane %v360_v5, 4  ;;  %v2230_v7 = vpop.f32.mrb[3].mxu1  ;;  %v3047_v5 = vpack.c.bf16 %v878_v3, %v877_v1 }
 0x2c3   :  { %v367_v8 = vadd.f32 %v365_v6, %v3552_v58  ;;  %v894_v6 = vld [vmem:[%s4042_s1 + $0x210] sm:$0xff] }
 0x2c5   :  { %3310 = vtanh.f32 %v367_v8  ;;  %v879_v8 = vld [vmem:[%s4042_s1 + $0x198] sm:$0xff] }
 0x2cf   :  { %v3311_v10 = vpop.eup %3310 }
 0x2d0   :  { %369 = vst [vmem:[#allocation2] sm:$0x30] %v3311_v10  ;;  %v371_v11 = vrot.slane %v3311_v10, 4  ;;  %v880_v10 = vld [vmem:[%s4042_s1 + $0x1a0] sm:$0xff] }
 0x2d2   :  { %2264 = vmatmul.mubr.f32.vlgmr.msra.gmra.mrb[4].mxu0 %v371_v11  ;;  %v3051_v11 = vpack.c.bf16 %v880_v10, %v879_v8 }
 0x2d3   :  { %2945 = vmatpush3.bf16.msra.mxu0 %v3393_v9  ;;  %2333 = vmatprep.mubr.msk.f32.mxu0 %vm3355_vm0, %v3356_v4 }
 0x2d4   :  { %2946 = vmatprep.subr.bf16.mxu0 %v3354_v2 }
 0x2d7   :  { %2948 = vmatpush3.bf16.msra.mxu0 %v3408_v15 }
 0x2d8   :  { %2949 = vmatprep.subr.bf16.mxu0 %v3354_v2 }
 0x2db   :  { %2951 = vmatpush3.bf16.msra.mxu0 %v3424_v21 }
 0x2dc   :  { %2952 = vmatprep.subr.bf16.mxu0 %v3354_v2 }
 0x2df   :  { %2954 = vmatpush3.bf16.msra.mxu0 %v3443_v28 }
 0x2e0   :  { %2955 = vmatprep.subr.bf16.mxu0 %v3354_v2 }
 0x2e3   :  { %2957 = vmatpush3.bf16.msra.mxu0 %v3459_v34 }
 0x2e4   :  { %2958 = vmatprep.subr.bf16.mxu0 %v3354_v2 }
 0x2e7   :  { %2960 = vmatpush3.bf16.msra.mxu0 %v3475_v40 }
 0x2e8   :  { %2961 = vmatprep.subr.bf16.mxu0 %v3354_v2 }
 0x2eb   :  { %2963 = vmatpush3.bf16.msra.mxu0 %v3491_v46 }
 0x2ec   :  { %2964 = vmatprep.subr.bf16.mxu0 %v3354_v2 }
 0x2ef   :  { %2966 = vmatpush3.bf16.msra.mxu0 %v3501_v50 }
 0x2f0   :  { %2991 = vmatprep.subr.bf16.mxu0 %v3354_v2 }
 0x3a5   :  { %v439_v12 = vpop.f32.mrb[4].mxu0 }
 0x3a6   :  { %v444_v13 = vrot.slane %v439_v12, 2  ;;  %v2265_v14 = vpop.f32.mrb[5].mxu0  ;;  %v895_v12 = vld [vmem:[%s4042_s1 + $0x218] sm:$0xff] }
 0x3a7   :  { %v881_v14 = vld [vmem:[%s4042_s1 + $0x1a8] sm:$0xff] }
 0x3a8   :  { %v446_v16 = vadd.f32 %v444_v13, %v3552_v58  ;;  %v3043_v58 = vpack.c.bf16 %v60_v57, %v59_v56  ;;  %v896_v13 = vld [vmem:[%s4042_s1 + $0x220] sm:$0xff] }
 0x3aa   :  { %3312 = vtanh.f32 %v446_v16  ;;  %v3731_v16 = vpack.c.bf16 %v896_v13, %v895_v12 }
 0x3b4   :  { %v3313_v17 = vpop.eup %3312 }
 0x3b5   :  { %448 = vst [vmem:[#allocation2] sm:$0xc0] %v3313_v17  ;;  %v450_v18 = vrot.slane %v3313_v17, 6  ;;  %v882_v17 = vld [vmem:[%s4042_s1 + $0x1b0] sm:$0xff] }
 0x3b7   :  { %2299 = vmatmul.mubr.f32.vlgmr.msra.gmra.mrb[4].mxu1 %v450_v18  ;;  %v897_v18 = vld [vmem:[%s4042_s1 + $0x228] sm:$0xff] }
 0x3b8   :  { %2969 = vmatpush3.bf16.msra.mxu1 %v3393_v9  ;;  %2368 = vmatprep.mubr.msk.f32.mxu1 %vm3355_vm0, %v3356_v4 }
 0x3b9   :  { %2970 = vmatprep.subr.bf16.mxu1 %v3354_v2 }
 0x3bc   :  { %2972 = vmatpush3.bf16.msra.mxu1 %v3408_v15  ;;  %v759_v27 = vld [vmem:[#allocation2] sm:$0xff] }
 0x3bd   :  { %2973 = vmatprep.subr.bf16.mxu1 %v3354_v2 }
 0x3c0   :  { %2975 = vmatpush3.bf16.msra.mxu1 %v3424_v21 }
 0x3c1   :  { %2976 = vmatprep.subr.bf16.mxu1 %v3354_v2 }
 0x3c4   :  { %2978 = vmatpush3.bf16.msra.mxu1 %v3443_v28 }
 0x3c5   :  { %2979 = vmatprep.subr.bf16.mxu1 %v3354_v2 }
 0x3c8   :  { %2981 = vmatpush3.bf16.msra.mxu1 %v3459_v34 }
 0x3c9   :  { %2982 = vmatprep.subr.bf16.mxu1 %v3354_v2 }
 0x3cc   :  { %2984 = vmatpush3.bf16.msra.mxu1 %v3475_v40 }
 0x3cd   :  { %2985 = vmatprep.subr.bf16.mxu1 %v3354_v2 }
 0x3d0   :  { %2987 = vmatpush3.bf16.msra.mxu1 %v3491_v46 }
 0x3d1   :  { %2988 = vmatprep.subr.bf16.mxu1 %v3354_v2 }
 0x3d4   :  { %2990 = vmatpush3.bf16.msra.mxu1 %v3501_v50 }
 0x48a   :  { %v518_v19 = vpop.f32.mrb[4].mxu1 }
 0x48b   :  { %v522_v20 = vadd.f32 %v518_v19, %v3550_v55  ;;  %v2300_v22 = vpop.f32.mrb[5].mxu1  ;;  %v3055_v19 = vpack.c.bf16 %v882_v17, %v881_v14 }
 0x48c   :  { %v883_v22 = vld [vmem:[%s4042_s1 + $0x1b8] sm:$0xff] }
 0x48d   :  { %3314 = vtanh.f32 %v522_v20  ;;  %v898_v20 = vld [vmem:[%s4042_s1 + $0x230] sm:$0xff] }
 0x497   :  { %v3315_v23 = vpop.eup %3314 }
 0x498   :  { %524 = vst [vmem:[#allocation2 + $0x8] sm:$0x3] %v3315_v23  ;;  %2334 = vmatmul.mubr.f32.vlgmr.msra.gmra.mrb[6].mxu0 %v3315_v23  ;;  %v884_v23 = vld [vmem:[%s4042_s1 + $0x1c0] sm:$0xff] }
 0x499   :  { %2993 = vmatpush3.bf16.msra.mxu0 %v3393_v9  ;;  %2403 = vmatprep.mubr.msk.f32.mxu0 %vm3355_vm0, %v3356_v4 }
 0x49a   :  { %2994 = vmatprep.subr.bf16.mxu0 %v3354_v2 }
 0x49d   :  { %2996 = vmatpush3.bf16.msra.mxu0 %v3408_v15 }
 0x49e   :  { %2997 = vmatprep.subr.bf16.mxu0 %v3354_v2 }
 0x4a1   :  { %2999 = vmatpush3.bf16.msra.mxu0 %v3424_v21 }
 0x4a2   :  { %3000 = vmatprep.subr.bf16.mxu0 %v3354_v2 }
 0x4a5   :  { %3002 = vmatpush3.bf16.msra.mxu0 %v3443_v28  ;;  %v45_v28 = vld [vmem:[%s4042_s1 + $0x100] sm:$0xff] }
 0x4a6   :  { %3003 = vmatprep.subr.bf16.mxu0 %v3354_v2  ;;  %v3015_v31 = vpack.c.bf16 %v46_v29, %v45_v28  ;;  %v887_v29 = vld [vmem:[%s4042_s1 + $0x1d8] sm:$0xff] }
 0x4a8   :  { %3016 = vmatprep.subr.bf16.mxu1 %v3015_v31 }
 0x4a9   :  { %3005 = vmatpush3.bf16.msra.mxu0 %v3459_v34 }
 0x4aa   :  { %3006 = vmatprep.subr.bf16.mxu0 %v3354_v2 }
 0x4ad   :  { %3008 = vmatpush3.bf16.msra.mxu0 %v3475_v40  ;;  %v49_v40 = vld [vmem:[%s4042_s1 + $0x120] sm:$0xff] }
 0x4ae   :  { %3009 = vmatprep.subr.bf16.mxu0 %v3354_v2  ;;  %v3023_v42 = vpack.c.bf16 %v50_v41, %v49_v40  ;;  %v891_v41 = vld [vmem:[%s4042_s1 + $0x1f8] sm:$0xff] }
 0x4b1   :  { %3011 = vmatpush3.bf16.msra.mxu0 %v3491_v46  ;;  %v53_v46 = vld [vmem:[%s4042_s1 + $0x140] sm:$0xff] }
 0x4b2   :  { %3012 = vmatprep.subr.bf16.mxu0 %v3354_v2  ;;  %v3031_v48 = vpack.c.bf16 %v54_v47, %v53_v46  ;;  %v3814_v46 = vpack.c.bf16 %v906_v44, %v905_v43  ;;  %v907_v47 = vld [vmem:[%s4042_s1 + $0x278] sm:$0xff] }
 0x4b5   :  { %3014 = vmatpush3.bf16.msra.mxu0 %v3501_v50  ;;  %v56_v50 = vld [vmem:[%s4042_s1 + $0x158] sm:$0xff] }
 0x4b6   :  { %v3035_v51 = vpack.c.bf16 %v56_v50, %v55_v49  ;;  %3048 = vmatprep.subr.bf16.mxu0 %v3047_v5  ;;  %v1744_v50 = vld [vmem:[%s4042_s1 + $0x181] ss:$0 sm:$0xff] }
 0x56b   :  { %v591_v9 = vpop.f32.mrb[6].mxu0 }
 0x56c   :  { %v596_v15 = vrot.slane %v591_v9, 6  ;;  %v2335_v21 = vpop.f32.mrb[7].mxu0  ;;  %v3059_v9 = vpack.c.bf16 %v884_v23, %v883_v22 }
 0x56d   :  { %v885_v21 = vld [vmem:[%s4042_s1 + $0x1c8] sm:$0xff] }
 0x56e   :  { %v598_v24 = vadd.f32 %v596_v15, %v3550_v55  ;;  %v3750_v15 = vpack.c.bf16 %v898_v20, %v897_v18 }
 0x570   :  { %3316 = vtanh.f32 %v598_v24  ;;  %v886_v24 = vld [vmem:[%s4042_s1 + $0x1d0] sm:$0xff] }
 0x57a   :  { %v3317_v25 = vpop.eup %3316 }
 0x57b   :  { %600 = vst [vmem:[#allocation2 + $0x8] sm:$0xc] %v3317_v25  ;;  %v602_v26 = vrot.slane %v3317_v25, 2  ;;  %v899_v25 = vld [vmem:[%s4042_s1 + $0x238] sm:$0xff] }
 0x57d   :  { %2369 = vmatmul.mubr.f32.vlgmr.msra.gmra.mrb[6].mxu1 %v602_v26  ;;  %v900_v26 = vld [vmem:[%s4042_s1 + $0x240] sm:$0xff] }
 0x57e   :  { %2438 = vmatprep.mubr.f32.mxu1 %v759_v27  ;;  %3018 = vmatpush3.bf16.msra.mxu1 %v3015_v31  ;;  %v3063_v27 = vpack.c.bf16 %v886_v24, %v885_v21  ;;  %v3766_v28 = vpack.c.bf16 %v900_v26, %v899_v25  ;;  %v901_v31 = vld [vmem:[%s4042_s1 + $0x248] sm:$0xff] }
 0x57f   :  { %3020 = vmatprep.subr.bf16.mxu1 %v3019_v33  ;;  %v1745_v26 = vld [vmem:[%s4042_s1 + $0x308] ss:$0 sm:$0xff] }
 0x582   :  { %3022 = vmatpush3.bf16.msra.mxu1 %v3019_v33  ;;  %v3067_v33 = vpack.c.bf16 %v888_v30, %v887_v29 }
 0x583   :  { %3024 = vmatprep.subr.bf16.mxu1 %v3023_v42 }
 0x586   :  { %3026 = vmatpush3.bf16.msra.mxu1 %v3023_v42  ;;  %v892_v42 = vld [vmem:[%s4042_s1 + $0x200] sm:$0xff] }
 0x587   :  { %3028 = vmatprep.subr.bf16.mxu1 %v3027_v45 }
 0x58a   :  { %3030 = vmatpush3.bf16.msra.mxu1 %v3027_v45  ;;  %v3075_v45 = vpack.c.bf16 %v892_v42, %v891_v41 }
 0x58b   :  { %3032 = vmatprep.subr.bf16.mxu1 %v3031_v48 }
 0x58e   :  { %3034 = vmatpush3.bf16.msra.mxu1 %v3031_v48  ;;  %v908_v48 = vld [vmem:[%s4042_s1 + $0x280] sm:$0xff] }
 0x58f   :  { %3036 = vmatprep.subr.bf16.mxu1 %v3035_v51  ;;  %v3825_v49 = vpack.c.bf16 %v908_v48, %v907_v47 }
 0x592   :  { %3038 = vmatpush3.bf16.msra.mxu1 %v3035_v51 }
 0x593   :  { %3040 = vmatprep.subr.bf16.mxu1 %v3039_v54 }
 0x596   :  { %3042 = vmatpush3.bf16.msra.mxu1 %v3039_v54 }
 0x597   :  { %3044 = vmatprep.subr.bf16.mxu1 %v3043_v58 }
 0x59a   :  { %3046 = vmatpush3.bf16.msra.mxu1 %v3043_v58 }
 0x59b   :  { %3079 = vmatprep.subr.bf16.mxu1 %v3354_v2 }
 0x650   :  { %v670_v34 = vpop.f32.mrb[6].mxu1 }
 0x651   :  { %v675_v35 = vrot.slane %v670_v34, 4  ;;  %v2370_v36 = vpop.f32.mrb[7].mxu1  ;;  %v3782_v34 = vpack.c.bf16 %v902_v32, %v901_v31 }
 0x652   :  { %v890_v36 = vld [vmem:[%s4042_s1 + $0x1f0] sm:$0xff] }
 0x653   :  { %v677_v37 = vadd.f32 %v675_v35, %v3550_v55  ;;  %v889_v35 = vld [vmem:[%s4042_s1 + $0x1e8] sm:$0xff] }
 0x655   :  { %3318 = vtanh.f32 %v677_v37  ;;  %v903_v37 = vld [vmem:[%s4042_s1 + $0x258] sm:$0xff] }
 0x65f   :  { %v3319_v38 = vpop.eup %3318 }
 0x660   :  { %679 = vst [vmem:[#allocation2 + $0x8] sm:$0x30] %v3319_v38  ;;  %v681_v39 = vrot.slane %v3319_v38, 4  ;;  %v904_v38 = vld [vmem:[%s4042_s1 + $0x260] sm:$0xff] }
 0x661   :  { %v3798_v40 = vpack.c.bf16 %v904_v38, %v903_v37 }
 0x662   :  { %2404 = vmatmul.mubr.f32.vlgmr.msra.gmra.mrb[8].mxu0 %v681_v39  ;;  %v3071_v39 = vpack.c.bf16 %v890_v36, %v889_v35 }
 0x663   :  { %3050 = vmatpush3.bf16.msra.mxu0 %v3047_v5 }
 0x664   :  { %3052 = vmatprep.subr.bf16.mxu0 %v3051_v11 }
 0x667   :  { %3054 = vmatpush3.bf16.msra.mxu0 %v3051_v11 }
 0x668   :  { %3056 = vmatprep.subr.bf16.mxu0 %v3055_v19 }
 0x66b   :  { %3058 = vmatpush3.bf16.msra.mxu0 %v3055_v19 }
 0x66c   :  { %3060 = vmatprep.subr.bf16.mxu0 %v3059_v9 }
 0x66f   :  { %3062 = vmatpush3.bf16.msra.mxu0 %v3059_v9 }
 0x670   :  { %3064 = vmatprep.subr.bf16.mxu0 %v3063_v27 }
 0x673   :  { %3066 = vmatpush3.bf16.msra.mxu0 %v3063_v27 }
 0x674   :  { %3068 = vmatprep.subr.bf16.mxu0 %v3067_v33 }
 0x677   :  { %3070 = vmatpush3.bf16.msra.mxu0 %v3067_v33 }
 0x678   :  { %3072 = vmatprep.subr.bf16.mxu0 %v3071_v39 }
 0x67b   :  { %3074 = vmatpush3.bf16.msra.mxu0 %v3071_v39 }
 0x67c   :  { %3076 = vmatprep.subr.bf16.mxu0 %v3075_v45 }
 0x67f   :  { %3078 = vmatpush3.bf16.msra.mxu0 %v3075_v45 }
 0x680   :  { %3103 = vmatprep.subr.bf16.mxu0 %v3354_v2 }
 0x735   :  { %v749_v59 = vpop.f32.mrb[8].mxu0 }
 0x736   :  { %v754_v60 = vrot.slane %v749_v59, 2  ;;  %v2405_v61 = vpop.f32.mrb[9].mxu0 }
 0x738   :  { %v756_v62 = vadd.f32 %v754_v60, %v3550_v55  ;;  %v893_v55 = vld [vmem:[%s4042_s1 + $0x208] sm:$0xff] }
 0x739   :  { %v3713_v7 = vpack.c.bf16 %v894_v6, %v893_v55 }
 0x73a   :  { %3320 = vtanh.f32 %v756_v62 }
 0x744   :  { %v3321_v63 = vpop.eup %3320 }
 0x745   :  { %758 = vst [vmem:[#allocation2 + $0x8] sm:$0xc0] %v3321_v63 }
 0x74c   :  { %v760_v0 = vld [vmem:[#allocation2 + $0x8] sm:$0xff] }
 0x74d   :  { %2439 = vmatmul.mubr.f32.vlgmr.msra.gmra.mrb[8].mxu1 %v760_v0  ;;  %v868_v0 = vlaneseq }
 0x74e   :  { %2508 = vmatprep.mubr.msk.f32.mxu1 %vm3355_vm0, %v3356_v4  ;;  %3081 = vmatpush3.bf16.msra.mxu1 %v3713_v7 }
 0x74f   :  { %3082 = vmatprep.subr.bf16.mxu1 %v3354_v2  ;;  %v3852_v5 = vand.u32 127, %v868_v0 }
 0x751   :  { %vm870_vm1 = vcmp.ge.s32.totalorder %v3852_v5, 5  ;;  %vm871_vm2 = vcmp.lt.s32.totalorder %v3852_v5, 10  ;;  %vm1732_vm8 = vcmp.ge.s32.totalorder %v3852_v5, 3  ;;  %vm1733_vm9 = vcmp.lt.s32.totalorder %v3852_v5, 6 }
 0x752   :  { %3084 = vmatpush3.bf16.msra.mxu1 %v3731_v16  ;;  %vm872_vm3 = vmand %vm870_vm1, %vm871_vm2 }
 0x753   :  { %3085 = vmatprep.subr.bf16.mxu1 %v3354_v2  ;;  %vm1734_vm11 = vmand %vm1732_vm8, %vm1733_vm9 }
 0x756   :  { %3087 = vmatpush3.bf16.msra.mxu1 %v3750_v15 }
 0x757   :  { %3088 = vmatprep.subr.bf16.mxu1 %v3354_v2 }
 0x75a   :  { %3090 = vmatpush3.bf16.msra.mxu1 %v3766_v28 }
 0x75b   :  { %3091 = vmatprep.subr.bf16.mxu1 %v3354_v2 }
 0x75e   :  { %3093 = vmatpush3.bf16.msra.mxu1 %v3782_v34 }
 0x75f   :  { %3094 = vmatprep.subr.bf16.mxu1 %v3354_v2 }
 0x762   :  { %3096 = vmatpush3.bf16.msra.mxu1 %v3798_v40 }
 0x763   :  { %3097 = vmatprep.subr.bf16.mxu1 %v3354_v2 }
 0x766   :  { %3099 = vmatpush3.bf16.msra.mxu1 %v3814_v46 }
 0x767   :  { %3100 = vmatprep.subr.bf16.mxu1 %v3354_v2 }
 0x76a   :  { %3102 = vmatpush3.bf16.msra.mxu1 %v3825_v49 }
 0x76b   :  { %3127 = vmatprep.subr.bf16.mxu1 %v3354_v2 }
 0x76d   :  { %2509 = vmatmul.mubr.f32.vlgmr.msra.gmra.mrb[10].mxu1 %v3356_v4 }
 0x76e   :  { %3129 = vmatpush3.bf16.msra.mxu1 %v3713_v7  ;;  %2578 = vmatprep.mubr.msk.f32.mxu1 %vm3355_vm0, %v3356_v4 }
 0x76f   :  { %3130 = vmatprep.subr.bf16.mxu1 %v3354_v2 }
 0x772   :  { %3132 = vmatpush3.bf16.msra.mxu1 %v3731_v16 }
 0x773   :  { %3133 = vmatprep.subr.bf16.mxu1 %v3354_v2 }
 0x776   :  { %3135 = vmatpush3.bf16.msra.mxu1 %v3750_v15 }
 0x777   :  { %3136 = vmatprep.subr.bf16.mxu1 %v3354_v2 }
 0x77a   :  { %3138 = vmatpush3.bf16.msra.mxu1 %v3766_v28 }
 0x77b   :  { %3139 = vmatprep.subr.bf16.mxu1 %v3354_v2 }
 0x77e   :  { %3141 = vmatpush3.bf16.msra.mxu1 %v3782_v34 }
 0x77f   :  { %3142 = vmatprep.subr.bf16.mxu1 %v3354_v2 }
 0x782   :  { %3144 = vmatpush3.bf16.msra.mxu1 %v3798_v40 }
 0x783   :  { %3145 = vmatprep.subr.bf16.mxu1 %v3354_v2 }
 0x786   :  { %3147 = vmatpush3.bf16.msra.mxu1 %v3814_v46 }
 0x787   :  { %3148 = vmatprep.subr.bf16.mxu1 %v3354_v2 }
 0x78a   :  { %3150 = vmatpush3.bf16.msra.mxu1 %v3825_v49 }
 0x78b   :  { %3175 = vmatprep.subr.bf16.mxu1 %v3354_v2 }
 0x820   :  { %v2440_v51 = vpop.f32.mrb[8].mxu1 }
 0x821   :  { %v837_v52 = vadd.f32 %v2440_v51, %v1744_v50  ;;  %v831_v53 = vpop.f32.mrb[9].mxu1 }
 0x822   :  { %v832_v54 = vadd.f32 %v1744_v50, %v831_v53 }
 0x823   :  { %v843_v56 = vmin.f32 %v837_v52, 20.0  ;;  %vm841_vm6 = vcmp.gt.f32.partialorder %v837_v52, 20.0 }
 0x824   :  { %v842_v57 = vmin.f32 %v832_v54, 20.0  ;;  %vm840_vm7 = vcmp.gt.f32.partialorder %v832_v54, 20.0 }
 0x825   :  { %v846_v58 = vmul.f32 1.442695, %v843_v56 }
 0x826   :  { %v844_v59 = vmul.f32 1.442695, %v842_v57 }
 0x827   :  { %3322 = vpow2.f32 %v846_v58 }
 0x828   :  { %3324 = vpow2.f32 %v844_v59 }
 0x831   :  { %v3323_v60 = vpop.eup %3322 }
 0x832   :  { %v3325_v61 = vpop.eup %3324  ;;  %v857_v62 = vadd.f32 1.0, %v3323_v60  ;;  %v860_v1 = vmul.f32 -0.5, %v3323_v60  ;;  %v863_v8 = vand.u32 2147483647, %v3323_v60 }
 0x833   :  { %v848_v63 = vadd.f32 1.0, %v3325_v61  ;;  %v851_v3 = vmul.f32 -0.5, %v3325_v61  ;;  %v854_v10 = vand.u32 2147483647, %v3325_v61 }
 0x834   :  { %3326 = vlog2.f32 %v857_v62  ;;  %v861_v55 = vadd.f32 1.0, %v860_v1  ;;  %vm864_vm4 = vcmp.lt.f32.partialorder %v863_v8, 0.0004427343  ;;  %v912_v62 = vld [vmem:[%s4042_s1 + $0x2a0] sm:$0xff] }
 0x835   :  { %3328 = vlog2.f32 %v848_v63  ;;  %v852_v6 = vadd.f32 1.0, %v851_v3  ;;  %vm855_vm5 = vcmp.lt.f32.partialorder %v854_v10, 0.0004427343  ;;  %v913_v10 = vld [vmem:[%s4042_s1 + $0x2a8] sm:$0xff] }
 0x836   :  { %v862_v14 = vmul.f32 %v3323_v60, %v861_v55 }
 0x837   :  { %v853_v18 = vmul.f32 %v3325_v61, %v852_v6 }
 0x83e   :  { %v3327_v11 = vpop.eup %3326 }
 0x83f   :  { %v3329_v12 = vpop.eup %3328  ;;  %v859_v13 = vmul.f32 0.6931472, %v3327_v11  ;;  %v914_v11 = vld [vmem:[%s4042_s1 + $0x2b0] sm:$0xff] }
 0x840   :  { %v850_v17 = vmul.f32 0.6931472, %v3329_v12  ;;  %v1072_v24 = vpop.f32.mrb[10].mxu1  ;;  %v3279_v12 = vpack.c.bf16 %v914_v11, %v913_v10 }
 0x841   :  { %v865_v19 = vsel %vm864_vm4, %v862_v14, %v859_v13  ;;  %v2510_v25 = vpop.f32.mrb[11].mxu1  ;;  %v915_v13 = vld [vmem:[%s4042_s1 + $0x2b8] sm:$0xff]  ;;  %v916_v14 = vld [vmem:[%s4042_s1 + $0x2c0] sm:$0xff] }
 0x842   :  { %v856_v20 = vsel %vm855_vm5, %v853_v18, %v850_v17  ;;  %v867_v22 = vsel %vm841_vm6, %v837_v52, %v865_v19  ;;  %v3283_v17 = vpack.c.bf16 %v916_v14, %v915_v13  ;;  %v917_v18 = vld [vmem:[%s4042_s1 + $0x2c8] sm:$0xff]  ;;  %v918_v19 = vld [vmem:[%s4042_s1 + $0x2d0] sm:$0xff] }
 0x843   :  { %v866_v23 = vsel %vm840_vm7, %v832_v54, %v856_v20  ;;  %v874_v9 = vsel %vm872_vm3, %v867_v22, %v837_v52  ;;  %v3287_v20 = vpack.c.bf16 %v918_v19, %v917_v18  ;;  %v919_v22 = vld [vmem:[%s4042_s1 + $0x2d8] sm:$0xff] }
 0x844   :  { %v873_v21 = vsel %vm872_vm3, %v866_v23, %v832_v54  ;;  %876 = vst [vmem:[%s4044_s2 + $0x8] sm:$0xff] %v874_v9  ;;  %v920_v23 = vld [vmem:[%s4042_s1 + $0x2e0] sm:$0xff] }
 0x845   :  { %875 = vst [vmem:[%s4044_s2] sm:$0xff] %v873_v21  ;;  %2473 = vmatprep.mubr.f32.mxu0 %v873_v21  ;;  %v921_v21 = vld [vmem:[%s4042_s1 + $0x2e8] sm:$0xff] }
 0x846   :  { %2474 = vmatmul.mubr.f32.vlgmr.msra.gmra.mrb[10].mxu0 %v874_v9  ;;  %v3291_v9 = vpack.c.bf16 %v920_v23, %v919_v22 }
 0x847   :  { %3105 = vmatpush3.bf16.msra.mxu0 %v3713_v7  ;;  %2543 = vmatprep.mubr.msk.f32.mxu0 %vm3355_vm0, %v3356_v4 }
 0x848   :  { %3106 = vmatprep.subr.bf16.mxu0 %v3354_v2 }
 0x84b   :  { %3108 = vmatpush3.bf16.msra.mxu0 %v3731_v16 }
 0x84c   :  { %3109 = vmatprep.subr.bf16.mxu0 %v3354_v2 }
 0x84f   :  { %3111 = vmatpush3.bf16.msra.mxu0 %v3750_v15 }
 0x850   :  { %3112 = vmatprep.subr.bf16.mxu0 %v3354_v2 }
 0x853   :  { %3114 = vmatpush3.bf16.msra.mxu0 %v3766_v28 }
 0x854   :  { %3115 = vmatprep.subr.bf16.mxu0 %v3354_v2 }
 0x857   :  { %3117 = vmatpush3.bf16.msra.mxu0 %v3782_v34 }
 0x858   :  { %3118 = vmatprep.subr.bf16.mxu0 %v3354_v2 }
 0x85b   :  { %3120 = vmatpush3.bf16.msra.mxu0 %v3798_v40 }
 0x85c   :  { %3121 = vmatprep.subr.bf16.mxu0 %v3354_v2 }
 0x85f   :  { %3123 = vmatpush3.bf16.msra.mxu0 %v3814_v46 }
 0x860   :  { %3124 = vmatprep.subr.bf16.mxu0 %v3354_v2 }
 0x863   :  { %3126 = vmatpush3.bf16.msra.mxu0 %v3825_v49 }
 0x864   :  { %3151 = vmatprep.subr.bf16.mxu0 %v3354_v2 }
 0x919   :  { %v2475_v27 = vpop.f32.mrb[10].mxu0 }
 0x91a   :  { %v3883_v29 = vadd.f32 %v2475_v27, %v1745_v26  ;;  %v997_v30 = vpop.f32.mrb[11].mxu0  ;;  %v924_v27 = vld [vmem:[%s4042_s1 + $0x300] sm:$0xff] }
 0x91b   :  { %v3885_v31 = vadd.f32 %v1745_v26, %v997_v30  ;;  %v923_v26 = vld [vmem:[%s4042_s1 + $0x2f8] sm:$0xff] }
 0x91c   :  { %v3299_v30 = vpack.c.bf16 %v924_v27, %v923_v26 }
 0x91d   :  { %v1076_v32 = vadd.f32 %v1072_v24, %v3885_v31  ;;  %v922_v24 = vld [vmem:[%s4042_s1 + $0x2f0] sm:$0xff] }
 0x91e   :  { %v3295_v25 = vpack.c.bf16 %v922_v24, %v921_v21 }
 0x91f   :  { %3330 = vtanh.f32 %v1076_v32 }
 0x929   :  { %v3331_v33 = vpop.eup %3330 }
 0x92a   :  { %1078 = vst [vmem:[#allocation2] sm:$0x3] %v3331_v33  ;;  %2544 = vmatmul.mubr.f32.vlgmr.msra.gmra.mrb[12].mxu0 %v3331_v33 }
 0x92b   :  { %3153 = vmatpush3.bf16.msra.mxu0 %v3713_v7  ;;  %2613 = vmatprep.mubr.msk.f32.mxu0 %vm3355_vm0, %v3356_v4 }
 0x92c   :  { %3154 = vmatprep.subr.bf16.mxu0 %v3354_v2 }
 0x92f   :  { %3156 = vmatpush3.bf16.msra.mxu0 %v3731_v16 }
 0x930   :  { %3157 = vmatprep.subr.bf16.mxu0 %v3354_v2 }
 0x933   :  { %3159 = vmatpush3.bf16.msra.mxu0 %v3750_v15 }
 0x934   :  { %3160 = vmatprep.subr.bf16.mxu0 %v3354_v2 }
 0x937   :  { %3162 = vmatpush3.bf16.msra.mxu0 %v3766_v28 }
 0x938   :  { %3163 = vmatprep.subr.bf16.mxu0 %v3354_v2 }
 0x93b   :  { %3165 = vmatpush3.bf16.msra.mxu0 %v3782_v34 }
 0x93c   :  { %3166 = vmatprep.subr.bf16.mxu0 %v3354_v2 }
 0x93f   :  { %3168 = vmatpush3.bf16.msra.mxu0 %v3798_v40 }
 0x940   :  { %3169 = vmatprep.subr.bf16.mxu0 %v3354_v2 }
 0x943   :  { %3171 = vmatpush3.bf16.msra.mxu0 %v3814_v46 }
 0x944   :  { %3172 = vmatprep.subr.bf16.mxu0 %v3354_v2 }
 0x947   :  { %3174 = vmatpush3.bf16.msra.mxu0 %v3825_v49 }
 0x948   :  { %3199 = vmatprep.subr.bf16.mxu0 %v3354_v2 }
 0x9fd   :  { %v1145_v35 = vpop.f32.mrb[12].mxu0 }
 0x9fe   :  { %v1150_v36 = vrot.slane %v1145_v35, 6  ;;  %v2545_v37 = vpop.f32.mrb[13].mxu0 }
 0xa00   :  { %v1152_v38 = vadd.f32 %v1150_v36, %v3885_v31 }
 0xa02   :  { %3332 = vtanh.f32 %v1152_v38  ;;  %v1746_v38 = vld [vmem:[%s4042_s1 + $0x309] ss:$0 sm:$0xff] }
 0xa0c   :  { %v3333_v39 = vpop.eup %3332 }
 0xa0d   :  { %1154 = vst [vmem:[#allocation2] sm:$0xc] %v3333_v39  ;;  %v1156_v41 = vrot.slane %v3333_v39, 2 }
 0xa0f   :  { %2579 = vmatmul.mubr.f32.vlgmr.msra.gmra.mrb[12].mxu1 %v1156_v41 }
 0xa10   :  { %3177 = vmatpush3.bf16.msra.mxu1 %v3713_v7  ;;  %2648 = vmatprep.mubr.msk.f32.mxu1 %vm3355_vm0, %v3356_v4 }
 0xa11   :  { %3178 = vmatprep.subr.bf16.mxu1 %v3354_v2 }
 0xa14   :  { %3180 = vmatpush3.bf16.msra.mxu1 %v3731_v16 }
 0xa15   :  { %3181 = vmatprep.subr.bf16.mxu1 %v3354_v2 }
 0xa18   :  { %3183 = vmatpush3.bf16.msra.mxu1 %v3750_v15 }
 0xa19   :  { %3184 = vmatprep.subr.bf16.mxu1 %v3354_v2 }
 0xa1c   :  { %3186 = vmatpush3.bf16.msra.mxu1 %v3766_v28 }
 0xa1d   :  { %3187 = vmatprep.subr.bf16.mxu1 %v3354_v2 }
 0xa20   :  { %3189 = vmatpush3.bf16.msra.mxu1 %v3782_v34 }
 0xa21   :  { %3190 = vmatprep.subr.bf16.mxu1 %v3354_v2 }
 0xa24   :  { %3192 = vmatpush3.bf16.msra.mxu1 %v3798_v40 }
 0xa25   :  { %3193 = vmatprep.subr.bf16.mxu1 %v3354_v2 }
 0xa28   :  { %3195 = vmatpush3.bf16.msra.mxu1 %v3814_v46 }
 0xa29   :  { %3196 = vmatprep.subr.bf16.mxu1 %v3354_v2 }
 0xa2c   :  { %3198 = vmatpush3.bf16.msra.mxu1 %v3825_v49 }
 0xa2d   :  { %3223 = vmatprep.subr.bf16.mxu1 %v3354_v2 }
 0xae2   :  { %v1224_v42 = vpop.f32.mrb[12].mxu1 }
 0xae3   :  { %v1229_v43 = vrot.slane %v1224_v42, 4  ;;  %v2580_v44 = vpop.f32.mrb[13].mxu1 }
 0xae5   :  { %v1231_v45 = vadd.f32 %v1229_v43, %v3885_v31 }
 0xae7   :  { %3334 = vtanh.f32 %v1231_v45 }
 0xaf1   :  { %v3335_v47 = vpop.eup %3334 }
 0xaf2   :  { %1233 = vst [vmem:[#allocation2] sm:$0x30] %v3335_v47  ;;  %v1235_v48 = vrot.slane %v3335_v47, 4 }
 0xaf4   :  { %2614 = vmatmul.mubr.f32.vlgmr.msra.gmra.mrb[14].mxu0 %v1235_v48 }
 0xaf5   :  { %3201 = vmatpush3.bf16.msra.mxu0 %v3713_v7  ;;  %2683 = vmatprep.mubr.msk.f32.mxu0 %vm3355_vm0, %v3356_v4 }
 0xaf6   :  { %3202 = vmatprep.subr.bf16.mxu0 %v3354_v2 }
 0xaf9   :  { %3204 = vmatpush3.bf16.msra.mxu0 %v3731_v16 }
 0xafa   :  { %3205 = vmatprep.subr.bf16.mxu0 %v3354_v2 }
 0xafd   :  { %3207 = vmatpush3.bf16.msra.mxu0 %v3750_v15 }
 0xafe   :  { %3208 = vmatprep.subr.bf16.mxu0 %v3354_v2 }
 0xb01   :  { %3210 = vmatpush3.bf16.msra.mxu0 %v3766_v28 }
 0xb02   :  { %3211 = vmatprep.subr.bf16.mxu0 %v3354_v2 }
 0xb05   :  { %3213 = vmatpush3.bf16.msra.mxu0 %v3782_v34 }
 0xb06   :  { %3214 = vmatprep.subr.bf16.mxu0 %v3354_v2 }
 0xb09   :  { %3216 = vmatpush3.bf16.msra.mxu0 %v3798_v40 }
 0xb0a   :  { %3217 = vmatprep.subr.bf16.mxu0 %v3354_v2 }
 0xb0d   :  { %3219 = vmatpush3.bf16.msra.mxu0 %v3814_v46 }
 0xb0e   :  { %3220 = vmatprep.subr.bf16.mxu0 %v3354_v2 }
 0xb11   :  { %3222 = vmatpush3.bf16.msra.mxu0 %v3825_v49 }
 0xb12   :  { %3247 = vmatprep.subr.bf16.mxu0 %v3354_v2 }
 0xbc7   :  { %v1303_v50 = vpop.f32.mrb[14].mxu0 }
 0xbc8   :  { %v1308_v51 = vrot.slane %v1303_v50, 2  ;;  %v2615_v52 = vpop.f32.mrb[15].mxu0 }
 0xbca   :  { %v1310_v53 = vadd.f32 %v1308_v51, %v3885_v31 }
 0xbcc   :  { %3336 = vtanh.f32 %v1310_v53 }
 0xbd6   :  { %v3337_v54 = vpop.eup %3336 }
 0xbd7   :  { %1312 = vst [vmem:[#allocation2] sm:$0xc0] %v3337_v54  ;;  %v1314_v56 = vrot.slane %v3337_v54, 6 }
 0xbd9   :  { %2649 = vmatmul.mubr.f32.vlgmr.msra.gmra.mrb[14].mxu1 %v1314_v56 }
 0xbda   :  { %3225 = vmatpush3.bf16.msra.mxu1 %v3713_v7  ;;  %2718 = vmatprep.mubr.msk.f32.mxu1 %vm3355_vm0, %v3356_v4 }
 0xbdb   :  { %3226 = vmatprep.subr.bf16.mxu1 %v3354_v2 }
 0xbde   :  { %3228 = vmatpush3.bf16.msra.mxu1 %v3731_v16  ;;  %v1623_v61 = vld [vmem:[#allocation2] sm:$0xff] }
 0xbdf   :  { %3229 = vmatprep.subr.bf16.mxu1 %v3354_v2 }
 0xbe2   :  { %3231 = vmatpush3.bf16.msra.mxu1 %v3750_v15 }
 0xbe3   :  { %3232 = vmatprep.subr.bf16.mxu1 %v3354_v2 }
 0xbe6   :  { %3234 = vmatpush3.bf16.msra.mxu1 %v3766_v28 }
 0xbe7   :  { %3235 = vmatprep.subr.bf16.mxu1 %v3354_v2 }
 0xbea   :  { %3237 = vmatpush3.bf16.msra.mxu1 %v3782_v34 }
 0xbeb   :  { %3238 = vmatprep.subr.bf16.mxu1 %v3354_v2 }
 0xbee   :  { %3240 = vmatpush3.bf16.msra.mxu1 %v3798_v40 }
 0xbef   :  { %3241 = vmatprep.subr.bf16.mxu1 %v3354_v2 }
 0xbf2   :  { %3243 = vmatpush3.bf16.msra.mxu1 %v3814_v46 }
 0xbf3   :  { %3244 = vmatprep.subr.bf16.mxu1 %v3354_v2 }
 0xbf6   :  { %3246 = vmatpush3.bf16.msra.mxu1 %v3825_v49 }
 0xcac   :  { %v1382_v57 = vpop.f32.mrb[14].mxu1 }
 0xcad   :  { %v1386_v58 = vadd.f32 %v1382_v57, %v3883_v29  ;;  %v2650_v59 = vpop.f32.mrb[15].mxu1 }
 0xcaf   :  { %3338 = vtanh.f32 %v1386_v58 }
 0xcb9   :  { %v3339_v60 = vpop.eup %3338 }
 0xcba   :  { %1388 = vst [vmem:[#allocation2 + $0x8] sm:$0x3] %v3339_v60  ;;  %2684 = vmatmul.mubr.f32.vlgmr.msra.gmra.mrb[16].mxu0 %v3339_v60 }
 0xcbb   :  { %3249 = vmatpush3.bf16.msra.mxu0 %v3713_v7  ;;  %2753 = vmatprep.mubr.msk.f32.mxu0 %vm3355_vm0, %v3356_v4 }
 0xcbc   :  { %3250 = vmatprep.subr.bf16.mxu0 %v3354_v2 }
 0xcbf   :  { %3252 = vmatpush3.bf16.msra.mxu0 %v3731_v16 }
 0xcc0   :  { %3253 = vmatprep.subr.bf16.mxu0 %v3354_v2 }
 0xcc3   :  { %3255 = vmatpush3.bf16.msra.mxu0 %v3750_v15 }
 0xcc4   :  { %3256 = vmatprep.subr.bf16.mxu0 %v3354_v2 }
 0xcc7   :  { %3258 = vmatpush3.bf16.msra.mxu0 %v3766_v28 }
 0xcc8   :  { %3259 = vmatprep.subr.bf16.mxu0 %v3354_v2 }
 0xccb   :  { %3261 = vmatpush3.bf16.msra.mxu0 %v3782_v34 }
 0xccc   :  { %3262 = vmatprep.subr.bf16.mxu0 %v3354_v2 }
 0xccf   :  { %3264 = vmatpush3.bf16.msra.mxu0 %v3798_v40  ;;  %v909_v40 = vld [vmem:[%s4042_s1 + $0x288] sm:$0xff] }
 0xcd0   :  { %3265 = vmatprep.subr.bf16.mxu0 %v3354_v2 }
 0xcd3   :  { %3267 = vmatpush3.bf16.msra.mxu0 %v3814_v46  ;;  %v911_v46 = vld [vmem:[%s4042_s1 + $0x298] sm:$0xff] }
 0xcd4   :  { %3268 = vmatprep.subr.bf16.mxu0 %v3354_v2  ;;  %v910_v2 = vld [vmem:[%s4042_s1 + $0x290] sm:$0xff]  ;;  %v3275_v63 = vpack.c.bf16 %v912_v62, %v911_v46 }
 0xcd7   :  { %3270 = vmatpush3.bf16.msra.mxu0 %v3825_v49  ;;  %v3271_v49 = vpack.c.bf16 %v910_v2, %v909_v40 }
 0xcd9   :  { %3272 = vmatprep.subr.bf16.mxu1 %v3271_v49 }
 0xd8d   :  { %v1455_v4 = vpop.f32.mrb[16].mxu0 }
 0xd8e   :  { %v1460_v7 = vrot.slane %v1455_v4, 6  ;;  %v2685_v16 = vpop.f32.mrb[17].mxu0 }
 0xd90   :  { %v1462_v15 = vadd.f32 %v1460_v7, %v3883_v29 }
 0xd92   :  { %3340 = vtanh.f32 %v1462_v15 }
 0xd9c   :  { %v3341_v28 = vpop.eup %3340 }
 0xd9d   :  { %1464 = vst [vmem:[#allocation2 + $0x8] sm:$0xc] %v3341_v28  ;;  %v1466_v34 = vrot.slane %v3341_v28, 2 }
 0xd9f   :  { %2719 = vmatmul.mubr.f32.vlgmr.msra.gmra.mrb[16].mxu1 %v1466_v34 }
 0xda0   :  { %2788 = vmatprep.mubr.f32.mxu1 %v1623_v61  ;;  %3274 = vmatpush3.bf16.msra.mxu1 %v3271_v49 }
 0xda1   :  { %3276 = vmatprep.subr.bf16.mxu1 %v3275_v63 }
 0xda4   :  { %3278 = vmatpush3.bf16.msra.mxu1 %v3275_v63 }
 0xda5   :  { %3280 = vmatprep.subr.bf16.mxu1 %v3279_v12 }
 0xda8   :  { %3282 = vmatpush3.bf16.msra.mxu1 %v3279_v12 }
 0xda9   :  { %3284 = vmatprep.subr.bf16.mxu1 %v3283_v17 }
 0xdac   :  { %3286 = vmatpush3.bf16.msra.mxu1 %v3283_v17 }
 0xdad   :  { %3288 = vmatprep.subr.bf16.mxu1 %v3287_v20 }
 0xdb0   :  { %3290 = vmatpush3.bf16.msra.mxu1 %v3287_v20 }
 0xdb1   :  { %3292 = vmatprep.subr.bf16.mxu1 %v3291_v9 }
 0xdb4   :  { %3294 = vmatpush3.bf16.msra.mxu1 %v3291_v9 }
 0xdb5   :  { %3296 = vmatprep.subr.bf16.mxu1 %v3295_v25 }
 0xdb8   :  { %3298 = vmatpush3.bf16.msra.mxu1 %v3295_v25 }
 0xdb9   :  { %3300 = vmatprep.subr.bf16.mxu1 %v3299_v30 }
 0xdbc   :  { %3302 = vmatpush3.bf16.msra.mxu1 %v3299_v30 }
 0xe72   :  { %v1534_v0 = vpop.f32.mrb[16].mxu1 }
 0xe73   :  { %v1539_v1 = vrot.slane %v1534_v0, 4  ;;  %v2720_v3 = vpop.f32.mrb[17].mxu1 }
 0xe75   :  { %v1541_v55 = vadd.f32 %v1539_v1, %v3883_v29 }
 0xe77   :  { %3342 = vtanh.f32 %v1541_v55 }
 0xe81   :  { %v3343_v6 = vpop.eup %3342 }
 0xe82   :  { %1543 = vst [vmem:[#allocation2 + $0x8] sm:$0x30] %v3343_v6  ;;  %v1545_v8 = vrot.slane %v3343_v6, 4 }
 0xe84   :  { %2754 = vmatmul.mubr.f32.vlgmr.msra.gmra.mrb[18].mxu0 %v1545_v8 }
 0xf57   :  { %v1613_v31 = vpop.f32.mrb[18].mxu0 }
 0xf58   :  { %v1618_v32 = vrot.slane %v1613_v31, 2  ;;  %v2755_v33 = vpop.f32.mrb[19].mxu0 }
 0xf5a   :  { %v1620_v35 = vadd.f32 %v1618_v32, %v3883_v29 }
 0xf5c   :  { %3344 = vtanh.f32 %v1620_v35 }
 0xf66   :  { %v3345_v36 = vpop.eup %3344 }
 0xf67   :  { %1622 = vst [vmem:[#allocation2 + $0x8] sm:$0xc0] %v3345_v36 }
 0xf6e   :  { %v1624_v37 = vld [vmem:[#allocation2 + $0x8] sm:$0xff] }
 0xf6f   :  { %2789 = vmatmul.mubr.f32.vlgmr.msra.gmra.mrb[18].mxu1 %v1624_v37 }
0x1042   :  { %v2790_v39 = vpop.f32.mrb[18].mxu1 }
0x1043   :  { %v1701_v41 = vadd.f32 %v2790_v39, %v1746_v38  ;;  %v1695_v42 = vpop.f32.mrb[19].mxu1 }
0x1044   :  { %v1696_v43 = vadd.f32 %v1746_v38, %v1695_v42 }
0x1045   :  { %v1707_v44 = vmin.f32 %v1701_v41, 20.0  ;;  %vm1705_vm12 = vcmp.gt.f32.partialorder %v1701_v41, 20.0 }
0x1046   :  { %v1706_v45 = vmin.f32 %v1696_v43, 20.0  ;;  %vm1704_vm14 = vcmp.gt.f32.partialorder %v1696_v43, 20.0 }
0x1047   :  { %v1710_v47 = vmul.f32 1.442695, %v1707_v44 }
0x1048   :  { %v1708_v48 = vmul.f32 1.442695, %v1706_v45 }
0x1049   :  { %3346 = vpow2.f32 %v1710_v47 }
0x104a   :  { %3348 = vpow2.f32 %v1708_v48 }
0x1053   :  { %v3347_v29 = vpop.eup %3346 }
0x1054   :  { %v3349_v50 = vpop.eup %3348  ;;  %v1721_v51 = vadd.f32 1.0, %v3347_v29  ;;  %v1724_v53 = vmul.f32 -0.5, %v3347_v29  ;;  %v1727_v57 = vand.u32 2147483647, %v3347_v29 }
0x1055   :  { %v1712_v52 = vadd.f32 1.0, %v3349_v50  ;;  %v1715_v54 = vmul.f32 -0.5, %v3349_v50  ;;  %v1718_v59 = vand.u32 2147483647, %v3349_v50 }
0x1056   :  { %3350 = vlog2.f32 %v1721_v51  ;;  %v1725_v56 = vadd.f32 1.0, %v1724_v53  ;;  %vm1728_vm10 = vcmp.lt.f32.partialorder %v1727_v57, 0.0004427343 }
0x1057   :  { %3352 = vlog2.f32 %v1712_v52  ;;  %v1716_v58 = vadd.f32 1.0, %v1715_v54  ;;  %vm1719_vm13 = vcmp.lt.f32.partialorder %v1718_v59, 0.0004427343 }
0x1058   :  { %v1726_v16 = vmul.f32 %v3347_v29, %v1725_v56 }
0x1059   :  { %v1717_v28 = vmul.f32 %v3349_v50, %v1716_v58 }
0x1060   :  { %v3351_v60 = vpop.eup %3350 }
0x1061   :  { %v3353_v4 = vpop.eup %3352  ;;  %v1723_v7 = vmul.f32 0.6931472, %v3351_v60 }
0x1062   :  { %v1714_v15 = vmul.f32 0.6931472, %v3353_v4 }
0x1063   :  { %v1729_v34 = vsel %vm1728_vm10, %v1726_v16, %v1723_v7 }
0x1064   :  { %v1731_v61 = vsel %vm1705_vm12, %v1701_v41, %v1729_v34  ;;  %v1720_v40 = vsel %vm1719_vm13, %v1717_v28, %v1714_v15 }
0x1065   :  { %v1736_v2 = vsel %vm1734_vm11, %v1731_v61, %v1701_v41  ;;  %v1730_v46 = vsel %vm1704_vm14, %v1696_v43, %v1720_v40 }
0x1066   :  { %1738 = vst [vmem:[%s4044_s2 + $0x18] sm:$0xff] %v1736_v2  ;;  %v1735_v5 = vsel %vm1734_vm11, %v1730_v46, %v1696_v43 }
0x1067   :  { %1737 = vst [vmem:[%s4044_s2 + $0x10] sm:$0xff] %v1735_v5 }

</bundles_post_ra>
